<compile_context>
chip_gen: v5e
topology: v5e:2x2
jax: 0.10.0
libtpu: 0.0.40
codegen_flags: <defaults>
</compile_context>

<pallas_src>
import functools
import math

import jax
import jax.numpy as jnp
from jax.experimental import pallas as pl
from jax.experimental.pallas import tpu as pltpu

NEG_SLOPE = 0.2          # firewood LinearBlock(activation='lrelu') slope
_VMEM_LIMIT = 32 << 20   # safe scoped-VMEM ceiling on v5e/v6e/v7x


def _lrelu(x):
    return jnp.where(x > 0, x, NEG_SLOPE * x)


def _disc_kernel(x_ref,
                 w1_ref, b1_ref,
                 w2_ref, b2_ref,
                 w3_ref, b3_ref,
                 w4_ref, b4_ref,
                 o_ref):
    # x_ref: (tile_b, in_dim) f32; w*: (in,out) bf16; b*: (1,out) f32.
    cdt = w1_ref.dtype
    x = x_ref[...].astype(cdt)          # in-kernel cast: one HBM pass over x

    h = jnp.dot(x, w1_ref[...],
                preferred_element_type=jnp.float32) + b1_ref[...]
    h = _lrelu(h).astype(cdt)

    h = jnp.dot(h, w2_ref[...],
                preferred_element_type=jnp.float32) + b2_ref[...]
    h = _lrelu(h).astype(cdt)

    h = jnp.dot(h, w3_ref[...],
                preferred_element_type=jnp.float32) + b3_ref[...]
    h = _lrelu(h).astype(cdt)

    # Final Linear(128,1): true (128,1) weight -> (tile_b,1) f32 logits.
    out = jnp.dot(h, w4_ref[...],
                  preferred_element_type=jnp.float32) + b4_ref[...]
    o_ref[...] = out.astype(o_ref.dtype)


def prepare_params(params_f32):
    """One-time conversion (call OUTSIDE the inference loop): bf16 weights,
    (1, out)-shaped f32 biases."""
    prepped = {}
    for i in range(1, 5):
        prepped[f"w{i}"] = params_f32[f"w{i}"].astype(jnp.bfloat16)
        prepped[f"b{i}"] = params_f32[f"b{i}"].reshape(1, -1).astype(jnp.float32)
    return prepped


def _choose_tile_b(batch, max_tile):
    if batch <= 16:
        return batch                       # single full-batch tile, no dead rows
    # >= 2 tiles so both v7x TensorCores get work; multiple of 8; <= max_tile.
    half = -(-batch // 2)
    return min(max_tile, ((half + 7) // 8) * 8)


@functools.partial(jax.jit, static_argnames=("max_tile_b",))
def discriminator_forward(x_nchw, params, *, max_tile_b=512):
    """x_nchw: (B, C, H, W) float32. params: output of prepare_params()."""
    B = x_nchw.shape[0]
    in_dim = math.prod(x_nchw.shape[1:])

    # Flatten (glue): same element ordering as torch.flatten on NCHW; free.
    x = x_nchw.reshape(B, in_dim)

    tile_b = _choose_tile_b(B, max_tile_b)
    num_tiles = pl.cdiv(B, tile_b)

    operands = (x,
                params["w1"], params["b1"],
                params["w2"], params["b2"],
                params["w3"], params["b3"],
                params["w4"], params["b4"])

    # Guard the VMEM-resident-weights strategy (matters for large in_dim on
    # v7x's 64 MiB VMEM): double-buffered f32 x tile + params must fit.
    weight_bytes = sum(a.size * a.dtype.itemsize for a in operands[1:])
    est_vmem = 2 * (tile_b * in_dim * 4 + weight_bytes + tile_b * 4)
    assert est_vmem < int(0.75 * _VMEM_LIMIT), (
        "in_dim too large for VMEM-resident weights; add a K-tiled grid axis "
        f"(estimated {est_vmem} bytes)")
    # TODO(synk): for in_dim >~ 64K features, tile layer 1 over K with an f32
    # VMEM accumulator instead of keeping w1 fully resident.

    x_spec = pl.BlockSpec((tile_b, in_dim), lambda i: (i, 0))
    out_spec = pl.BlockSpec((tile_b, 1), lambda i: (i, 0))

    def resident(arr):
        # Grid-invariant block index -> fetched once, stays VMEM-resident.
        return pl.BlockSpec(arr.shape, lambda i: (0, 0))

    in_specs = [x_spec] + [resident(a) for a in operands[1:]]

    flops = 2 * B * (in_dim * 256 + 256 * 256 + 256 * 128 + 128 * 1)
    bytes_accessed = x.size * x.dtype.itemsize + weight_bytes + B * 4

    return pl.pallas_call(
        _disc_kernel,
        out_shape=jax.ShapeDtypeStruct((B, 1), jnp.float32),
        grid_spec=pltpu.PrefetchScalarGridSpec(
            num_scalar_prefetch=0,
            grid=(num_tiles,),
            in_specs=in_specs,
            out_specs=out_spec,
        ),
        compiler_params=pltpu.CompilerParams(
            dimension_semantics=("parallel",),
            vmem_limit_bytes=_VMEM_LIMIT,
        ),
        cost_estimate=pl.CostEstimate(
            flops=flops, transcendentals=0, bytes_accessed=bytes_accessed),
    )(*operands)


def init_params(key, in_dim):
    """Deterministic synthetic init (Kaiming-ish normal scaling), f32."""
    dims = [(in_dim, 256), (256, 256), (256, 128), (128, 1)]
    params = {}
    for i, (din, dout) in enumerate(dims, start=1):
        key, kw, kb = jax.random.split(key, 3)
        scale = 1.0 / jnp.sqrt(jnp.float32(din))
        params[f"w{i}"] = jax.random.normal(kw, (din, dout), jnp.float32) * scale
        params[f"b{i}"] = jax.random.normal(kb, (dout,), jnp.float32) * 0.01
    return params


if __name__ == "__main__":
    # Small shapes consistent with the module: resolution=(16,16), channels=4.
    B, C, H, W = 2, 4, 16, 16
    in_dim = C * H * W  # 1024

    key = jax.random.PRNGKey(0)
    key, kx = jax.random.split(key)
    x = jax.random.normal(kx, (B, C, H, W), jnp.float32)

    params_f32 = init_params(key, in_dim)
    params = prepare_params(params_f32)        # one-time bf16 conversion

    out = discriminator_forward(x, params)
    out = jax.block_until_ready(out)
    assert out.shape == (B, 1)

    # Reference in plain JAX with the SAME bf16 operand quantization the kernel
    # uses (f32 accumulation), so the comparison isolates kernel correctness.
    h = x.reshape(B, in_dim).astype(jnp.bfloat16)
    for i in range(1, 4):
        h = jnp.dot(h, params_f32[f"w{i}"].astype(jnp.bfloat16),
                    preferred_element_type=jnp.float32) + params_f32[f"b{i}"]
        h = jnp.where(h > 0, h, NEG_SLOPE * h).astype(jnp.bfloat16)
    ref = jnp.dot(h, params_f32["w4"].astype(jnp.bfloat16),
                  preferred_element_type=jnp.float32) + params_f32["b4"]

    assert jnp.allclose(out, ref, atol=1e-2, rtol=1e-2), (out, ref)

    print("KERNEL_OK")
</pallas_src>

<mosaic_0001>
module attributes {stable_mosaic.version = 11 : i64} {
  func.func @_disc_kernel(%arg0: i32, %arg1: memref<2x1024xf32, #tpu.memory_space<vmem>>, %arg2: memref<1024x256xbf16, #tpu.memory_space<vmem>>, %arg3: memref<1x256xf32, #tpu.memory_space<vmem>>, %arg4: memref<256x256xbf16, #tpu.memory_space<vmem>>, %arg5: memref<1x256xf32, #tpu.memory_space<vmem>>, %arg6: memref<256x128xbf16, #tpu.memory_space<vmem>>, %arg7: memref<1x128xf32, #tpu.memory_space<vmem>>, %arg8: memref<128x1xbf16, #tpu.memory_space<vmem>>, %arg9: memref<1x1xf32, #tpu.memory_space<vmem>>, %arg10: memref<2x1xf32, #tpu.memory_space<vmem>>) attributes {dimension_semantics = [#tpu.dimension_semantics<parallel>], iteration_bounds = array<i64: 1>, scalar_prefetch = 0 : i64, scratch_operands = 0 : i64, tpu.core_type = #tpu.core_type<tc>, window_params = [{transform_indices = @transform_0, window_bounds = array<i64: 2, 1024>}, {pipeline_mode = #tpu.pipeline_mode<synchronous>, transform_indices = @transform_1, window_bounds = array<i64: 1024, 256>}, {pipeline_mode = #tpu.pipeline_mode<synchronous>, transform_indices = @transform_2, window_bounds = array<i64: 1, 256>}, {pipeline_mode = #tpu.pipeline_mode<synchronous>, transform_indices = @transform_3, window_bounds = array<i64: 256, 256>}, {pipeline_mode = #tpu.pipeline_mode<synchronous>, transform_indices = @transform_4, window_bounds = array<i64: 1, 256>}, {pipeline_mode = #tpu.pipeline_mode<synchronous>, transform_indices = @transform_5, window_bounds = array<i64: 256, 128>}, {pipeline_mode = #tpu.pipeline_mode<synchronous>, transform_indices = @transform_6, window_bounds = array<i64: 1, 128>}, {pipeline_mode = #tpu.pipeline_mode<synchronous>, transform_indices = @transform_7, window_bounds = array<i64: 128, 1>}, {pipeline_mode = #tpu.pipeline_mode<synchronous>, transform_indices = @transform_8, window_bounds = array<i64: 1, 1>}, {transform_indices = @transform_9, window_bounds = array<i64: 2, 1>}]} {
    %c0 = arith.constant 0 : index
    %c0_0 = arith.constant 0 : index
    %0 = vector.load %arg1[%c0, %c0_0] : memref<2x1024xf32, #tpu.memory_space<vmem>>, vector<2x1024xf32>
    %1 = arith.truncf %0 : vector<2x1024xf32> to vector<2x1024xbf16>
    %c0_1 = arith.constant 0 : index
    %c0_2 = arith.constant 0 : index
    %2 = vector.load %arg2[%c0_1, %c0_2] : memref<1024x256xbf16, #tpu.memory_space<vmem>>, vector<1024x256xbf16>
    %cst = arith.constant dense<0.000000e+00> : vector<2x256xf32>
    %3 = tpu.matmul %1, %2, %cst {dimension_numbers = #tpu.dot_dimension_numbers<[1], [0], [0], [1], [0, 0, 1, 1], [], []>} : vector<2x1024xbf16>, vector<1024x256xbf16>, vector<2x256xf32> -> vector<2x256xf32>
    %c0_3 = arith.constant 0 : index
    %c0_4 = arith.constant 0 : index
    %4 = vector.load %arg3[%c0_3, %c0_4] : memref<1x256xf32, #tpu.memory_space<vmem>>, vector<1x256xf32>
    %5 = vector.broadcast %4 : vector<1x256xf32> to vector<2x256xf32>
    %6 = arith.addf %3, %5 : vector<2x256xf32>
    %cst_5 = arith.constant 0.000000e+00 : f32
    %7 = vector.broadcast %cst_5 : f32 to vector<2x256xf32>
    %8 = arith.cmpf ogt, %6, %7 : vector<2x256xf32>
    %cst_6 = arith.constant 2.000000e-01 : f32
    %9 = vector.broadcast %cst_6 : f32 to vector<2x256xf32>
    %10 = arith.mulf %9, %6 : vector<2x256xf32>
    %11 = arith.select %8, %6, %10 : vector<2x256xi1>, vector<2x256xf32>
    %12 = arith.truncf %11 : vector<2x256xf32> to vector<2x256xbf16>
    %c0_7 = arith.constant 0 : index
    %c0_8 = arith.constant 0 : index
    %13 = vector.load %arg4[%c0_7, %c0_8] : memref<256x256xbf16, #tpu.memory_space<vmem>>, vector<256x256xbf16>
    %cst_9 = arith.constant dense<0.000000e+00> : vector<2x256xf32>
    %14 = tpu.matmul %12, %13, %cst_9 {dimension_numbers = #tpu.dot_dimension_numbers<[1], [0], [0], [1], [0, 0, 1, 1], [], []>} : vector<2x256xbf16>, vector<256x256xbf16>, vector<2x256xf32> -> vector<2x256xf32>
    %c0_10 = arith.constant 0 : index
    %c0_11 = arith.constant 0 : index
    %15 = vector.load %arg5[%c0_10, %c0_11] : memref<1x256xf32, #tpu.memory_space<vmem>>, vector<1x256xf32>
    %16 = vector.broadcast %15 : vector<1x256xf32> to vector<2x256xf32>
    %17 = arith.addf %14, %16 : vector<2x256xf32>
    %cst_12 = arith.constant 0.000000e+00 : f32
    %18 = vector.broadcast %cst_12 : f32 to vector<2x256xf32>
    %19 = arith.cmpf ogt, %17, %18 : vector<2x256xf32>
    %cst_13 = arith.constant 2.000000e-01 : f32
    %20 = vector.broadcast %cst_13 : f32 to vector<2x256xf32>
    %21 = arith.mulf %20, %17 : vector<2x256xf32>
    %22 = arith.select %19, %17, %21 : vector<2x256xi1>, vector<2x256xf32>
    %23 = arith.truncf %22 : vector<2x256xf32> to vector<2x256xbf16>
    %c0_14 = arith.constant 0 : index
    %c0_15 = arith.constant 0 : index
    %24 = vector.load %arg6[%c0_14, %c0_15] : memref<256x128xbf16, #tpu.memory_space<vmem>>, vector<256x128xbf16>
    %cst_16 = arith.constant dense<0.000000e+00> : vector<2x128xf32>
    %25 = tpu.matmul %23, %24, %cst_16 {dimension_numbers = #tpu.dot_dimension_numbers<[1], [0], [0], [1], [0, 0, 1, 1], [], []>} : vector<2x256xbf16>, vector<256x128xbf16>, vector<2x128xf32> -> vector<2x128xf32>
    %c0_17 = arith.constant 0 : index
    %c0_18 = arith.constant 0 : index
    %26 = vector.load %arg7[%c0_17, %c0_18] : memref<1x128xf32, #tpu.memory_space<vmem>>, vector<1x128xf32>
    %27 = vector.broadcast %26 : vector<1x128xf32> to vector<2x128xf32>
    %28 = arith.addf %25, %27 : vector<2x128xf32>
    %cst_19 = arith.constant 0.000000e+00 : f32
    %29 = vector.broadcast %cst_19 : f32 to vector<2x128xf32>
    %30 = arith.cmpf ogt, %28, %29 : vector<2x128xf32>
    %cst_20 = arith.constant 2.000000e-01 : f32
    %31 = vector.broadcast %cst_20 : f32 to vector<2x128xf32>
    %32 = arith.mulf %31, %28 : vector<2x128xf32>
    %33 = arith.select %30, %28, %32 : vector<2x128xi1>, vector<2x128xf32>
    %34 = arith.truncf %33 : vector<2x128xf32> to vector<2x128xbf16>
    %c0_21 = arith.constant 0 : index
    %c0_22 = arith.constant 0 : index
    %35 = vector.load %arg8[%c0_21, %c0_22] : memref<128x1xbf16, #tpu.memory_space<vmem>>, vector<128x1xbf16>
    %cst_23 = arith.constant dense<0.000000e+00> : vector<2x1xf32>
    %36 = tpu.matmul %34, %35, %cst_23 {dimension_numbers = #tpu.dot_dimension_numbers<[1], [0], [0], [1], [0, 0, 1, 1], [], []>} : vector<2x128xbf16>, vector<128x1xbf16>, vector<2x1xf32> -> vector<2x1xf32>
    %c0_24 = arith.constant 0 : index
    %c0_25 = arith.constant 0 : index
    %37 = vector.load %arg9[%c0_24, %c0_25] : memref<1x1xf32, #tpu.memory_space<vmem>>, vector<1x1xf32>
    %38 = vector.broadcast %37 : vector<1x1xf32> to vector<2x1xf32>
    %39 = arith.addf %36, %38 : vector<2x1xf32>
    %c0_26 = arith.constant 0 : index
    %c0_27 = arith.constant 0 : index
    %40 = vector.load %arg10[%c0_26, %c0_27] : memref<2x1xf32, #tpu.memory_space<vmem>>, vector<2x1xf32>
    tpu.vector_store %arg10[%c0_26, %c0_27], %39 {strides = array<i32>} : memref<2x1xf32, #tpu.memory_space<vmem>>, vector<2x1xf32>,
    return
  }
  func.func @transform_0(%arg0: i32) -> (i32, i32) {
    %c0_i32 = arith.constant 0 : i32
    %c0_i32_0 = arith.constant 0 : i32
    return %arg0, %c0_i32 : i32, i32
  }
  func.func @transform_1(%arg0: i32) -> (i32, i32) {
    %c0_i32 = arith.constant 0 : i32
    %c0_i32_0 = arith.constant 0 : i32
    %c0_i32_1 = arith.constant 0 : i32
    return %c0_i32, %c0_i32_0 : i32, i32
  }
  func.func @transform_2(%arg0: i32) -> (i32, i32) {
    %c0_i32 = arith.constant 0 : i32
    %c0_i32_0 = arith.constant 0 : i32
    %c0_i32_1 = arith.constant 0 : i32
    return %c0_i32, %c0_i32_0 : i32, i32
  }
  func.func @transform_3(%arg0: i32) -> (i32, i32) {
    %c0_i32 = arith.constant 0 : i32
    %c0_i32_0 = arith.constant 0 : i32
    %c0_i32_1 = arith.constant 0 : i32
    return %c0_i32, %c0_i32_0 : i32, i32
  }
  func.func @transform_4(%arg0: i32) -> (i32, i32) {
    %c0_i32 = arith.constant 0 : i32
    %c0_i32_0 = arith.constant 0 : i32
    %c0_i32_1 = arith.constant 0 : i32
    return %c0_i32, %c0_i32_0 : i32, i32
  }
  func.func @transform_5(%arg0: i32) -> (i32, i32) {
    %c0_i32 = arith.constant 0 : i32
    %c0_i32_0 = arith.constant 0 : i32
    %c0_i32_1 = arith.constant 0 : i32
    return %c0_i32, %c0_i32_0 : i32, i32
  }
  func.func @transform_6(%arg0: i32) -> (i32, i32) {
    %c0_i32 = arith.constant 0 : i32
    %c0_i32_0 = arith.constant 0 : i32
    %c0_i32_1 = arith.constant 0 : i32
    return %c0_i32, %c0_i32_0 : i32, i32
  }
  func.func @transform_7(%arg0: i32) -> (i32, i32) {
    %c0_i32 = arith.constant 0 : i32
    %c0_i32_0 = arith.constant 0 : i32
    %c0_i32_1 = arith.constant 0 : i32
    return %c0_i32, %c0_i32_0 : i32, i32
  }
  func.func @transform_8(%arg0: i32) -> (i32, i32) {
    %c0_i32 = arith.constant 0 : i32
    %c0_i32_0 = arith.constant 0 : i32
    %c0_i32_1 = arith.constant 0 : i32
    return %c0_i32, %c0_i32_0 : i32, i32
  }
  func.func @transform_9(%arg0: i32) -> (i32, i32) {
    %c0_i32 = arith.constant 0 : i32
    %c0_i32_0 = arith.constant 0 : i32
    return %arg0, %c0_i32 : i32, i32
  }
}

</mosaic_0001>

<bundles_post_ra>
// kernel: discriminator_forward.1
= control target key start
LH: loop header
LB: loop body
LE: loop exit
PB: predicated region body
PF: predicated region fallthrough
CT: control target
= control target key end

     0   :  { %s2763_s0 = inlined_call_operand.vmem [shape: f32[2,1024], index: 0, kind: input, shape index: {}]   ;;  %s2764_s1 = inlined_call_operand.hbm [shape: bf16[1024,256], index: 1, kind: input, shape index: {}]   ;;  %s2765_s2 = inlined_call_operand.vmem [shape: f32[1,256], index: 2, kind: input, shape index: {}]   ;;  %s2766_s3 = inlined_call_operand.hbm [shape: bf16[256,256], index: 3, kind: input, shape index: {}]   ;;  %s2767_s4 = inlined_call_operand.vmem [shape: f32[1,256], index: 4, kind: input, shape index: {}]   ;;  %s2768_s5 = inlined_call_operand.vmem [shape: bf16[256,128], index: 5, kind: input, shape index: {}]   ;;  %s2769_s6 = inlined_call_operand.vmem [shape: f32[1,128], index: 6, kind: input, shape index: {}]   ;;  %s2770_s7 = inlined_call_operand.vmem [shape: bf16[128,1], index: 7, kind: input, shape index: {}]   ;;  %s2771_s8 = inlined_call_operand.<no memory space> [shape: f32[1,1], index: 8, kind: input, shape index: {}]   ;;  %s2772_s9 = inlined_call_operand.vmem [shape: f32[2,1], index: 9, kind: output, shape index: {}]  }
   0x1   :  { %v14_v0 = vstv %s2771_s8 }
   0x2   :  { %15 = vst [vmem:[#allocation2] sm:$0x1] %v14_v0 }
   0x3   :  { %16 = vsyncpa [#allocation4], 0  ;;  %s24_s13 = sshll.u32 %s2764_s1, 4  ;;  %s25_s13 = int_to_ptr.hbm [resolvable:$true] %s24_s13 }
   0x4   :  { %17 = vsyncpa [#allocation6], 0  ;;  %s2574_s14 = smov [#allocation3]   ;;  %s39_s18 = sshll.u32 %s2766_s3, 4  ;;  %s40_s18 = int_to_ptr.hbm [resolvable:$true] %s39_s18 }
   0x5   :  { %s26_s15 = sshll.u32 %s2574_s14, 4  ;;  %s2575_s19 = smov 128   ;;  %s27_s15 = int_to_ptr.vmem [resolvable:$true] %s26_s15 }
   0x6   :  { %s2576_s20 = smov 8   ;;  %s2577_s8 = smov [#allocation5]  }
   0x7   :  { %32 = dma.hbm_to_vmem [thread:$0]  %s25_s13, 16384, %s27_s15, [#allocation4], %s2575_s19, %s2575_s19, %s2576_s20  }
   0x8   :  { %s41_s21 = sshll.u32 %s2577_s8, 4  ;;  %s42_s21 = int_to_ptr.vmem [resolvable:$true] %s41_s21 }
   0x9   :  { %47 = dma.hbm_to_vmem [thread:$0]  %s40_s18, 4096, %s42_s21, [#allocation6], %s2575_s19, %s2575_s19, %s2576_s20  }
   0xa   :  { %2570 = dma.done.wait [#allocation4], 16384  }
   0xb   :  { %2571 = vsyncadd [#allocation4], 4294950912 }
   0xc   :  { %2572 = dma.done.wait [#allocation6], 4096  }
   0xd   :  { %2573 = vsyncadd [#allocation6], 4294963200  ;;  %v1654_v1 = vld [vmem:[#allocation3 + $0x70] sm:$0xf]  ;;  %v2347_v2 = vld [vmem:[#allocation3 + $0x74] sm:$0xf0] }
   0xe   :  { %v1718_v3 = vld [vmem:[#allocation3 + $0xf0] sm:$0xf]  ;;  %v1655_v4 = vor.u32 %v2347_v2, %v1654_v1  ;;  %v2363_v5 = vld [vmem:[#allocation3 + $0xf4] sm:$0xf0]  ;;  %v1646_v12 = vld [vmem:[#allocation3 + $0x60] sm:$0xf] }
   0xf   :  { %v1782_v6 = vld [vmem:[#allocation3 + $0x170] sm:$0xf]  ;;  %v2379_v7 = vld [vmem:[#allocation3 + $0x174] sm:$0xf0]  ;;  %v1719_v8 = vor.u32 %v2363_v5, %v1718_v3  ;;  %v2345_v14 = vld [vmem:[#allocation3 + $0x64] sm:$0xf0] }
  0x10   :  { %v1783_v9 = vor.u32 %v2379_v7, %v1782_v6  ;;  %v1846_v10 = vld [vmem:[#allocation3 + $0x1f0] sm:$0xf]  ;;  %v2395_v11 = vld [vmem:[#allocation3 + $0x1f4] sm:$0xf0]  ;;  %871 = vmatpush.bf16.msra.mxu0 %v1655_v4  ;;  %v1710_v15 = vld [vmem:[#allocation3 + $0xe0] sm:$0xf]  ;;  %v1647_v17 = vor.u32 %v2345_v14, %v1646_v12 }
  0x11   :  { %v1847_v13 = vor.u32 %v2395_v11, %v1846_v10  ;;  %v2361_v16 = vld [vmem:[#allocation3 + $0xe4] sm:$0xf0]  ;;  %884 = vmatpush.bf16.msra.mxu1 %v1719_v8  ;;  %v1774_v19 = vld [vmem:[#allocation3 + $0x160] sm:$0xf]  ;;  %v1638_v24 = vld [vmem:[#allocation3 + $0x50] sm:$0xf] }
  0x12   :  { %897 = vmatpush.bf16.msra.mxu2 %v1783_v9  ;;  %v1711_v18 = vor.u32 %v2361_v16, %v1710_v15  ;;  %v2377_v20 = vld [vmem:[#allocation3 + $0x164] sm:$0xf0]  ;;  %v1838_v21 = vld [vmem:[#allocation3 + $0x1e0] sm:$0xf]  ;;  %v2343_v25 = vld [vmem:[#allocation3 + $0x54] sm:$0xf0] }
  0x13   :  { %910 = vmatpush.bf16.msra.mxu3 %v1847_v13  ;;  %v1775_v22 = vor.u32 %v2377_v20, %v1774_v19  ;;  %v2393_v23 = vld [vmem:[#allocation3 + $0x1e4] sm:$0xf0]  ;;  %v1702_v27 = vld [vmem:[#allocation3 + $0xd0] sm:$0xf]  ;;  %v2359_v28 = vld [vmem:[#allocation3 + $0xd4] sm:$0xf0]  ;;  %v1639_v30 = vor.u32 %v2343_v25, %v1638_v24 }
  0x14   :  { %v1839_v26 = vor.u32 %v2393_v23, %v1838_v21  ;;  %v1766_v29 = vld [vmem:[#allocation3 + $0x150] sm:$0xf]  ;;  %872 = vmatpush.bf16.msra.mxu0 %v1647_v17  ;;  %v2375_v31 = vld [vmem:[#allocation3 + $0x154] sm:$0xf0]  ;;  %v1703_v34 = vor.u32 %v2359_v28, %v1702_v27  ;;  %v1630_v36 = vld [vmem:[#allocation3 + $0x40] sm:$0xf] }
  0x15   :  { %v1830_v32 = vld [vmem:[#allocation3 + $0x1d0] sm:$0xf]  ;;  %v2391_v33 = vld [vmem:[#allocation3 + $0x1d4] sm:$0xf0]  ;;  %885 = vmatpush.bf16.msra.mxu1 %v1711_v18  ;;  %v1767_v35 = vor.u32 %v2375_v31, %v1766_v29  ;;  %v2341_v37 = vld [vmem:[#allocation3 + $0x44] sm:$0xf0] }
  0x16   :  { %898 = vmatpush.bf16.msra.mxu2 %v1775_v22  ;;  %v1694_v38 = vld [vmem:[#allocation3 + $0xc0] sm:$0xf]  ;;  %v1831_v39 = vor.u32 %v2391_v33, %v1830_v32  ;;  %v2357_v40 = vld [vmem:[#allocation3 + $0xc4] sm:$0xf0]  ;;  %v1631_v45 = vor.u32 %v2341_v37, %v1630_v36  ;;  %v1622_v48 = vld [vmem:[#allocation3 + $0x30] sm:$0xf] }
  0x17   :  { %911 = vmatpush.bf16.msra.mxu3 %v1839_v26  ;;  %v1758_v41 = vld [vmem:[#allocation3 + $0x140] sm:$0xf]  ;;  %v2373_v42 = vld [vmem:[#allocation3 + $0x144] sm:$0xf0]  ;;  %v1695_v46 = vor.u32 %v2357_v40, %v1694_v38  ;;  %v2339_v49 = vld [vmem:[#allocation3 + $0x34] sm:$0xf0] }
  0x18   :  { %v1822_v43 = vld [vmem:[#allocation3 + $0x1c0] sm:$0xf]  ;;  %v2389_v44 = vld [vmem:[#allocation3 + $0x1c4] sm:$0xf0]  ;;  %873 = vmatpush.bf16.msra.mxu0 %v1639_v30  ;;  %v1759_v47 = vor.u32 %v2373_v42, %v1758_v41  ;;  %v1686_v50 = vld [vmem:[#allocation3 + $0xb0] sm:$0xf]  ;;  %v1623_v57 = vor.u32 %v2339_v49, %v1622_v48 }
  0x19   :  { %886 = vmatpush.bf16.msra.mxu1 %v1703_v34  ;;  %v1823_v51 = vor.u32 %v2389_v44, %v1822_v43  ;;  %v2355_v52 = vld [vmem:[#allocation3 + $0xb4] sm:$0xf0]  ;;  %v1750_v53 = vld [vmem:[#allocation3 + $0x130] sm:$0xf]  ;;  %v1614_v60 = vld [vmem:[#allocation3 + $0x20] sm:$0xf] }
  0x1a   :  { %899 = vmatpush.bf16.msra.mxu2 %v1767_v35  ;;  %v2371_v54 = vld [vmem:[#allocation3 + $0x134] sm:$0xf0]  ;;  %v1814_v55 = vld [vmem:[#allocation3 + $0x1b0] sm:$0xf]  ;;  %v1687_v58 = vor.u32 %v2355_v52, %v1686_v50  ;;  %v2337_v61 = vld [vmem:[#allocation3 + $0x24] sm:$0xf0] }
  0x1b   :  { %912 = vmatpush.bf16.msra.mxu3 %v1831_v39  ;;  %v2387_v56 = vld [vmem:[#allocation3 + $0x1b4] sm:$0xf0]  ;;  %v1751_v59 = vor.u32 %v2371_v54, %v1750_v53  ;;  %v1678_v62 = vld [vmem:[#allocation3 + $0xa0] sm:$0xf]  ;;  %v2353_v0 = vld [vmem:[#allocation3 + $0xa4] sm:$0xf0]  ;;  %v1615_v5 = vor.u32 %v2337_v61, %v1614_v60 }
  0x1c   :  { %874 = vmatpush.bf16.msra.mxu0 %v1631_v45  ;;  %v1815_v63 = vor.u32 %v2387_v56, %v1814_v55  ;;  %v1742_v1 = vld [vmem:[#allocation3 + $0x120] sm:$0xf]  ;;  %v2369_v2 = vld [vmem:[#allocation3 + $0x124] sm:$0xf0]  ;;  %v1679_v6 = vor.u32 %v2353_v0, %v1678_v62  ;;  %v1606_v8 = vld [vmem:[#allocation3 + $0x10] sm:$0xf] }
  0x1d   :  { %887 = vmatpush.bf16.msra.mxu1 %v1695_v46  ;;  %v1806_v3 = vld [vmem:[#allocation3 + $0x1a0] sm:$0xf]  ;;  %v2385_v4 = vld [vmem:[#allocation3 + $0x1a4] sm:$0xf0]  ;;  %v1743_v7 = vor.u32 %v2369_v2, %v1742_v1  ;;  %v2335_v9 = vld [vmem:[#allocation3 + $0x14] sm:$0xf0] }
  0x1e   :  { %900 = vmatpush.bf16.msra.mxu2 %v1759_v47  ;;  %v1670_v10 = vld [vmem:[#allocation3 + $0x90] sm:$0xf]  ;;  %v1807_v11 = vor.u32 %v2385_v4, %v1806_v3  ;;  %v2351_v12 = vld [vmem:[#allocation3 + $0x94] sm:$0xf0]  ;;  %v1607_v17 = vor.u32 %v2335_v9, %v1606_v8  ;;  %v1598_v18 = vld [vmem:[#allocation3] sm:$0xf] }
  0x1f   :  { %913 = vmatpush.bf16.msra.mxu3 %v1823_v51  ;;  %v1734_v13 = vld [vmem:[#allocation3 + $0x110] sm:$0xf]  ;;  %v2367_v14 = vld [vmem:[#allocation3 + $0x114] sm:$0xf0]  ;;  %v2333_v19 = vld [vmem:[#allocation3 + $0x4] sm:$0xf0]  ;;  %v1671_v20 = vor.u32 %v2351_v12, %v1670_v10 }
  0x20   :  { %875 = vmatpush.bf16.msra.mxu0 %v1623_v57  ;;  %v1798_v15 = vld [vmem:[#allocation3 + $0x190] sm:$0xf]  ;;  %v2383_v16 = vld [vmem:[#allocation3 + $0x194] sm:$0xf0]  ;;  %v1735_v21 = vor.u32 %v2367_v14, %v1734_v13  ;;  %v1662_v22 = vld [vmem:[#allocation3 + $0x80] sm:$0xf]  ;;  %v1599_v32 = vor.u32 %v2333_v19, %v1598_v18 }
  0x21   :  { %888 = vmatpush.bf16.msra.mxu1 %v1687_v58  ;;  %v2349_v23 = vld [vmem:[#allocation3 + $0x84] sm:$0xf0]  ;;  %v1726_v24 = vld [vmem:[#allocation3 + $0x100] sm:$0xf]  ;;  %v1799_v25 = vor.u32 %v2383_v16, %v1798_v15  ;;  %v1910_v29 = vld [vmem:[#allocation3 + $0x270] sm:$0xf] }
  0x22   :  { %901 = vmatpush.bf16.msra.mxu2 %v1751_v59  ;;  %v2365_v26 = vld [vmem:[#allocation3 + $0x104] sm:$0xf0]  ;;  %v1790_v27 = vld [vmem:[#allocation3 + $0x180] sm:$0xf]  ;;  %v2411_v30 = vld [vmem:[#allocation3 + $0x274] sm:$0xf0]  ;;  %v1663_v36 = vor.u32 %v2349_v23, %v1662_v22 }
  0x23   :  { %914 = vmatpush.bf16.msra.mxu3 %v1815_v63  ;;  %v2381_v28 = vld [vmem:[#allocation3 + $0x184] sm:$0xf0]  ;;  %v1974_v31 = vld [vmem:[#allocation3 + $0x2f0] sm:$0xf]  ;;  %v2427_v33 = vld [vmem:[#allocation3 + $0x2f4] sm:$0xf0]  ;;  %v1727_v37 = vor.u32 %v2365_v26, %v1726_v24  ;;  %v1911_v41 = vor.u32 %v2411_v30, %v1910_v29 }
  0x24   :  { %876 = vmatpush.bf16.msra.mxu0 %v1615_v5  ;;  %v2038_v34 = vld [vmem:[#allocation3 + $0x370] sm:$0xf]  ;;  %v2443_v35 = vld [vmem:[#allocation3 + $0x374] sm:$0xf0]  ;;  %v1791_v40 = vor.u32 %v2381_v28, %v1790_v27  ;;  %v1975_v42 = vor.u32 %v2427_v33, %v1974_v31  ;;  %v1902_v44 = vld [vmem:[#allocation3 + $0x260] sm:$0xf] }
  0x25   :  { %889 = vmatpush.bf16.msra.mxu1 %v1679_v6  ;;  %v2102_v38 = vld [vmem:[#allocation3 + $0x3f0] sm:$0xf]  ;;  %v2459_v39 = vld [vmem:[#allocation3 + $0x3f4] sm:$0xf0]  ;;  %v2039_v43 = vor.u32 %v2443_v35, %v2038_v34  ;;  %v2409_v45 = vld [vmem:[#allocation3 + $0x264] sm:$0xf0] }
  0x26   :  { %902 = vmatpush.bf16.msra.mxu2 %v1743_v7  ;;  %v1966_v46 = vld [vmem:[#allocation3 + $0x2e0] sm:$0xf]  ;;  %v2103_v47 = vor.u32 %v2459_v39, %v2102_v38  ;;  %v2425_v48 = vld [vmem:[#allocation3 + $0x2e4] sm:$0xf0]  ;;  %v66_v53 = vld [vmem:[%s2763_s0] sm:$0xff]  ;;  %v1903_v54 = vor.u32 %v2409_v45, %v1902_v44  ;;  %vm1588_vm5 = vcmask 1024  }
  0x27   :  { %915 = vmatpush.bf16.msra.mxu3 %v1807_v11  ;;  %v2030_v49 = vld [vmem:[#allocation3 + $0x360] sm:$0xf]  ;;  %v2441_v50 = vld [vmem:[#allocation3 + $0x364] sm:$0xf0]  ;;  %70 = vst [vmem:[#allocation1] ss:$4 sm:$0xff] %v66_v53  ;;  %v1967_v55 = vor.u32 %v2425_v48, %v1966_v46 }
  0x28   :  { %877 = vmatpush.bf16.msra.mxu0 %v1607_v17  ;;  %v2094_v51 = vld [vmem:[#allocation3 + $0x3e0] sm:$0xf]  ;;  %v2457_v52 = vld [vmem:[#allocation3 + $0x3e4] sm:$0xf0]  ;;  %v2031_v56 = vor.u32 %v2441_v50, %v2030_v49  ;;  %v1894_v57 = vld [vmem:[#allocation3 + $0x250] sm:$0xf] }
  0x29   :  { %890 = vmatpush.bf16.msra.mxu1 %v1671_v20  ;;  %v2407_v58 = vld [vmem:[#allocation3 + $0x254] sm:$0xf0]  ;;  %v1958_v59 = vld [vmem:[#allocation3 + $0x2d0] sm:$0xf]  ;;  %v2095_v60 = vor.u32 %v2457_v52, %v2094_v51  ;;  %v1886_v3 = vld [vmem:[#allocation3 + $0x240] sm:$0xf] }
  0x2a   :  { %903 = vmatpush.bf16.msra.mxu2 %v1735_v21  ;;  %v2423_v61 = vld [vmem:[#allocation3 + $0x2d4] sm:$0xf0]  ;;  %v2022_v62 = vld [vmem:[#allocation3 + $0x350] sm:$0xf]  ;;  %v1895_v2 = vor.u32 %v2407_v58, %v1894_v57  ;;  %v2405_v4 = vld [vmem:[#allocation3 + $0x244] sm:$0xf0] }
  0x2b   :  { %916 = vmatpush.bf16.msra.mxu3 %v1799_v25  ;;  %v2439_v63 = vld [vmem:[#allocation3 + $0x354] sm:$0xf0]  ;;  %v2086_v0 = vld [vmem:[#allocation3 + $0x3d0] sm:$0xf]  ;;  %v1959_v5 = vor.u32 %v2423_v61, %v1958_v59  ;;  %v1950_v7 = vld [vmem:[#allocation3 + $0x2c0] sm:$0xf]  ;;  %v1887_v16 = vor.u32 %v2405_v4, %v1886_v3 }
  0x2c   :  { %878 = vmatpush.bf16.msra.mxu0 %v1599_v32  ;;  %v2455_v1 = vld [vmem:[#allocation3 + $0x3d4] sm:$0xf0]  ;;  %v2023_v6 = vor.u32 %v2439_v63, %v2022_v62  ;;  %v2421_v8 = vld [vmem:[#allocation3 + $0x2c4] sm:$0xf0]  ;;  %v2014_v9 = vld [vmem:[#allocation3 + $0x340] sm:$0xf] }
  0x2d   :  { %891 = vmatpush.bf16.msra.mxu1 %v1663_v36  ;;  %v2087_v10 = vor.u32 %v2455_v1, %v2086_v0  ;;  %v2437_v11 = vld [vmem:[#allocation3 + $0x344] sm:$0xf0]  ;;  %v2078_v12 = vld [vmem:[#allocation3 + $0x3c0] sm:$0xf]  ;;  %v1951_v17 = vor.u32 %v2421_v8, %v1950_v7  ;;  %v1878_v23 = vld [vmem:[#allocation3 + $0x230] sm:$0xf] }
  0x2e   :  { %904 = vmatpush.bf16.msra.mxu2 %v1727_v37  ;;  %v2453_v13 = vld [vmem:[#allocation3 + $0x3c4] sm:$0xf0]  ;;  %v73_v15 = vld.sshfl [vmem:[#allocation1] sm:$0xff pattern:$0x73625140]  ;;  %v2015_v22 = vor.u32 %v2437_v11, %v2014_v9  ;;  %v67_v46 = vld [vmem:[%s2763_s0 + $0x8] sm:$0xff] }
  0x2f   :  { %917 = vmatpush.bf16.msra.mxu3 %v1791_v40  ;;  %v75_v14 = vld.sshfl [vmem:[#allocation1 + $0x10] sm:$0xff pattern:$0x73625140]  ;;  %v2642_v19 = vpack.c.bf16 %v73_v15, %v73_v15  ;;  %v76_v20 = vld.sshfl [vmem:[#allocation1 + $0x18] sm:$0xff pattern:$0x73625140]  ;;  %v2079_v28 = vor.u32 %v2453_v13, %v2078_v12 }
  0x30   :  { %923 = vmatpush.bf16.msrb.mxu0 %v1911_v41  ;;  %v2640_v18 = vpack.c.bf16 %v75_v14, %v75_v14  ;;  %v74_v21 = vld.sshfl [vmem:[#allocation1 + $0x8] sm:$0xff pattern:$0x73625140]  ;;  %v2403_v24 = vld [vmem:[#allocation3 + $0x234] sm:$0xf0]  ;;  %v2644_v26 = vpack.c.bf16 %v76_v20, %v76_v20 }
  0x31   :  { %936 = vmatpush.bf16.msrb.mxu1 %v1975_v42  ;;  %v1942_v25 = vld [vmem:[#allocation3 + $0x2b0] sm:$0xf]  ;;  %v2646_v27 = vpack.c.bf16 %v74_v21, %v74_v21  ;;  %v2419_v29 = vld [vmem:[#allocation3 + $0x2b4] sm:$0xf0]  ;;  %879 = vmatmul.bf16.vlgmr.msra.gmra.mxu0 %v2642_v19  ;;  %v1879_v34 = vor.u32 %v2403_v24, %v1878_v23  ;;  %v1870_v37 = vld [vmem:[#allocation3 + $0x220] sm:$0xf] }
  0x32   :  { %949 = vmatpush.bf16.msrb.mxu2 %v2039_v43  ;;  %v2006_v30 = vld [vmem:[#allocation3 + $0x330] sm:$0xf]  ;;  %v2435_v31 = vld [vmem:[#allocation3 + $0x334] sm:$0xf0]  ;;  %918 = vmatmul.bf16.vlgmr.msra.gmra.mxu3 %v2644_v26  ;;  %v1943_v35 = vor.u32 %v2419_v29, %v1942_v25  ;;  %v2401_v38 = vld [vmem:[#allocation3 + $0x224] sm:$0xf0] }
  0x33   :  { %962 = vmatpush.bf16.msrb.mxu3 %v2103_v47  ;;  %905 = vmatmul.bf16.vlgmr.msra.gmra.mxu2 %v2640_v18  ;;  %v2070_v32 = vld [vmem:[#allocation3 + $0x3b0] sm:$0xf]  ;;  %v2451_v33 = vld [vmem:[#allocation3 + $0x3b4] sm:$0xf0]  ;;  %v2007_v36 = vor.u32 %v2435_v31, %v2006_v30  ;;  %v1934_v39 = vld [vmem:[#allocation3 + $0x2a0] sm:$0xf]  ;;  %v1871_v47 = vor.u32 %v2401_v38, %v1870_v37 }
  0x34   :  { %924 = vmatpush.bf16.msrb.mxu0 %v1903_v54  ;;  %892 = vmatmul.bf16.vlgmr.msra.gmra.mxu1 %v2646_v27  ;;  %v2071_v40 = vor.u32 %v2451_v33, %v2070_v32  ;;  %v2417_v41 = vld [vmem:[#allocation3 + $0x2a4] sm:$0xf0]  ;;  %v1998_v42 = vld [vmem:[#allocation3 + $0x320] sm:$0xf]  ;;  %72 = vst [vmem:[#allocation1 + $0x20] ss:$4 sm:$0xff] %v67_v46 }
  0x35   :  { %937 = vmatpush.bf16.msrb.mxu1 %v1967_v55  ;;  %v2433_v43 = vld [vmem:[#allocation3 + $0x324] sm:$0xf0]  ;;  %v2062_v44 = vld [vmem:[#allocation3 + $0x3a0] sm:$0xf]  ;;  %v1935_v48 = vor.u32 %v2417_v41, %v1934_v39  ;;  %v1862_v50 = vld [vmem:[#allocation3 + $0x210] sm:$0xf] }
  0x36   :  { %950 = vmatpush.bf16.msrb.mxu2 %v2031_v56  ;;  %v2449_v45 = vld [vmem:[#allocation3 + $0x3a4] sm:$0xf0]  ;;  %v1999_v49 = vor.u32 %v2433_v43, %v1998_v42  ;;  %v2399_v51 = vld [vmem:[#allocation3 + $0x214] sm:$0xf0]  ;;  %v1926_v52 = vld [vmem:[#allocation3 + $0x290] sm:$0xf] }
  0x37   :  { %963 = vmatpush.bf16.msrb.mxu3 %v2095_v60  ;;  %v2063_v53 = vor.u32 %v2449_v45, %v2062_v44  ;;  %v2415_v54 = vld [vmem:[#allocation3 + $0x294] sm:$0xf0]  ;;  %v1990_v55 = vld [vmem:[#allocation3 + $0x310] sm:$0xf]  ;;  %v1854_v59 = vld [vmem:[#allocation3 + $0x200] sm:$0xf]  ;;  %v1863_v60 = vor.u32 %v2399_v51, %v1862_v50 }
  0x38   :  { %925 = vmatpush.bf16.msrb.mxu0 %v1895_v2  ;;  %v2431_v56 = vld [vmem:[#allocation3 + $0x314] sm:$0xf0]  ;;  %v2054_v57 = vld [vmem:[#allocation3 + $0x390] sm:$0xf]  ;;  %v2397_v61 = vld [vmem:[#allocation3 + $0x204] sm:$0xf0]  ;;  %v1927_v0 = vor.u32 %v2415_v54, %v1926_v52 }
  0x39   :  { %938 = vmatpush.bf16.msrb.mxu1 %v1959_v5  ;;  %v2447_v58 = vld [vmem:[#allocation3 + $0x394] sm:$0xf0]  ;;  %v1918_v62 = vld [vmem:[#allocation3 + $0x280] sm:$0xf]  ;;  %v2413_v63 = vld [vmem:[#allocation3 + $0x284] sm:$0xf0]  ;;  %v1991_v1 = vor.u32 %v2431_v56, %v1990_v55  ;;  %v1855_v12 = vor.u32 %v2397_v61, %v1854_v59 }
  0x3a   :  { %951 = vmatpush.bf16.msrb.mxu2 %v2023_v6  ;;  %v1982_v2 = vld [vmem:[#allocation3 + $0x300] sm:$0xf]  ;;  %v2429_v3 = vld [vmem:[#allocation3 + $0x304] sm:$0xf0]  ;;  %v2055_v5 = vor.u32 %v2447_v58, %v2054_v57  ;;  %v2346_v7 = vld [vmem:[#allocation3 + $0x74] sm:$0xf] }
  0x3b   :  { %964 = vmatpush.bf16.msrb.mxu3 %v2087_v10  ;;  %v2046_v4 = vld [vmem:[#allocation3 + $0x380] sm:$0xf]  ;;  %v2445_v6 = vld [vmem:[#allocation3 + $0x384] sm:$0xf0]  ;;  %v1656_v8 = vld [vmem:[#allocation3 + $0x78] sm:$0xf0] }
  0x3c   :  { %926 = vmatpush.bf16.msrb.mxu0 %v1887_v16  ;;  %v2362_v9 = vld [vmem:[#allocation3 + $0xf4] sm:$0xf]  ;;  %v1720_v10 = vld [vmem:[#allocation3 + $0xf8] sm:$0xf0]  ;;  %v1919_v16 = vor.u32 %v2413_v63, %v1918_v62  ;;  %v2344_v21 = vld [vmem:[#allocation3 + $0x64] sm:$0xf]  ;;  %v2047_v23 = vor.u32 %v2445_v6, %v2046_v4  ;;  %v1659_v24 = vor.u32 %v2346_v7, %v1656_v8 }
  0x3d   :  { %939 = vmatpush.bf16.msrb.mxu1 %v1951_v17  ;;  %v2378_v11 = vld [vmem:[#allocation3 + $0x174] sm:$0xf]  ;;  %v1784_v13 = vld [vmem:[#allocation3 + $0x178] sm:$0xf0]  ;;  %v1983_v17 = vor.u32 %v2429_v3, %v1982_v2  ;;  %v1723_v29 = vor.u32 %v2362_v9, %v1720_v10  ;;  %v2360_v31 = vld [vmem:[#allocation3 + $0xe4] sm:$0xf] }
  0x3e   :  { %952 = vmatpush.bf16.msrb.mxu2 %v2015_v22  ;;  %v2394_v14 = vld [vmem:[#allocation3 + $0x1f4] sm:$0xf]  ;;  %v1848_v15 = vld [vmem:[#allocation3 + $0x1f8] sm:$0xf0]  ;;  %v1648_v22 = vld [vmem:[#allocation3 + $0x68] sm:$0xf0]  ;;  %v1787_v30 = vor.u32 %v2378_v11, %v1784_v13 }
  0x3f   :  { %965 = vmatpush.bf16.msrb.mxu3 %v2079_v28  ;;  %v79_v20 = vld.sshfl [vmem:[#allocation1 + $0x30] sm:$0xff pattern:$0x73625140]  ;;  %v77_v25 = vld.sshfl [vmem:[#allocation1 + $0x20] sm:$0xff pattern:$0x73625140]  ;;  %v1851_v33 = vor.u32 %v2394_v14, %v1848_v15  ;;  %v1651_v42 = vor.u32 %v2344_v21, %v1648_v22 }
  0x40   :  { %927 = vmatpush.bf16.msrb.mxu0 %v1879_v34  ;;  %v80_v28 = vld.sshfl [vmem:[#allocation1 + $0x38] sm:$0xff pattern:$0x73625140]  ;;  %v78_v32 = vld.sshfl [vmem:[#allocation1 + $0x28] sm:$0xff pattern:$0x73625140]  ;;  %v2655_v34 = vpack.c.bf16 %v79_v20, %v79_v20  ;;  %v2657_v38 = vpack.c.bf16 %v77_v25, %v77_v25 }
  0x41   :  { %940 = vmatpush.bf16.msrb.mxu1 %v1943_v35  ;;  %v1712_v35 = vld [vmem:[#allocation3 + $0xe8] sm:$0xf0]  ;;  %v2659_v39 = vpack.c.bf16 %v80_v28, %v80_v28  ;;  %v2661_v43 = vpack.c.bf16 %v78_v32, %v78_v32  ;;  %v2342_v46 = vld [vmem:[#allocation3 + $0x54] sm:$0xf]  ;;  %v1704_v50 = vld [vmem:[#allocation3 + $0xd8] sm:$0xf0] }
  0x42   :  { %953 = vmatpush.bf16.msrb.mxu2 %v2007_v36  ;;  %v2376_v36 = vld [vmem:[#allocation3 + $0x164] sm:$0xf]  ;;  %v1776_v37 = vld [vmem:[#allocation3 + $0x168] sm:$0xf0]  ;;  %v1715_v44 = vor.u32 %v2360_v31, %v1712_v35  ;;  %v2374_v51 = vld [vmem:[#allocation3 + $0x154] sm:$0xf] }
  0x43   :  { %966 = vmatpush.bf16.msrb.mxu3 %v2071_v40  ;;  %v2392_v40 = vld [vmem:[#allocation3 + $0x1e4] sm:$0xf]  ;;  %v1840_v41 = vld [vmem:[#allocation3 + $0x1e8] sm:$0xf0]  ;;  %v1779_v45 = vor.u32 %v2376_v36, %v1776_v37  ;;  %v1768_v52 = vld [vmem:[#allocation3 + $0x158] sm:$0xf0] }
  0x44   :  { %928 = vmatpush.bf16.msrb.mxu0 %v1871_v47  ;;  %v1640_v47 = vld [vmem:[#allocation3 + $0x58] sm:$0xf0]  ;;  %v1771_v57 = vor.u32 %v2374_v51, %v1768_v52  ;;  %v2340_v58 = vld [vmem:[#allocation3 + $0x44] sm:$0xf]  ;;  %v1632_v59 = vld [vmem:[#allocation3 + $0x48] sm:$0xf0] }
  0x45   :  { %941 = vmatpush.bf16.msrb.mxu1 %v1935_v48  ;;  %v2358_v48 = vld [vmem:[#allocation3 + $0xd4] sm:$0xf]  ;;  %v1832_v54 = vld [vmem:[#allocation3 + $0x1d8] sm:$0xf0]  ;;  %v1643_v55 = vor.u32 %v2342_v46, %v1640_v47  ;;  %v1696_v62 = vld [vmem:[#allocation3 + $0xc8] sm:$0xf0]  ;;  %v1635_v3 = vor.u32 %v2340_v58, %v1632_v59 }
  0x46   :  { %954 = vmatpush.bf16.msrb.mxu2 %v1999_v49  ;;  %v1843_v49 = vor.u32 %v2392_v40, %v1840_v41  ;;  %v1707_v56 = vor.u32 %v2358_v48, %v1704_v50  ;;  %v2372_v63 = vld [vmem:[#allocation3 + $0x144] sm:$0xf]  ;;  %v1824_v2 = vld [vmem:[#allocation3 + $0x1c8] sm:$0xf0]  ;;  %v2338_v6 = vld [vmem:[#allocation3 + $0x34] sm:$0xf] }
  0x47   :  { %967 = vmatpush.bf16.msrb.mxu3 %v2063_v53  ;;  %v2390_v53 = vld [vmem:[#allocation3 + $0x1d4] sm:$0xf]  ;;  %v1624_v7 = vld [vmem:[#allocation3 + $0x38] sm:$0xf0]  ;;  %v2336_v20 = vld [vmem:[#allocation3 + $0x24] sm:$0xf] }
  0x48   :  { %929 = vmatpush.bf16.msrb.mxu0 %v1863_v60  ;;  %v2356_v60 = vld [vmem:[#allocation3 + $0xc4] sm:$0xf]  ;;  %v1835_v61 = vor.u32 %v2390_v53, %v1832_v54  ;;  %v2354_v8 = vld [vmem:[#allocation3 + $0xb4] sm:$0xf]  ;;  %v1688_v10 = vld [vmem:[#allocation3 + $0xb8] sm:$0xf0]  ;;  %v1627_v15 = vor.u32 %v2338_v6, %v1624_v7 }
  0x49   :  { %942 = vmatpush.bf16.msrb.mxu1 %v1927_v0  ;;  %v1760_v0 = vld [vmem:[#allocation3 + $0x148] sm:$0xf0]  ;;  %v1699_v4 = vor.u32 %v2356_v60, %v1696_v62  ;;  %v2370_v11 = vld [vmem:[#allocation3 + $0x134] sm:$0xf]  ;;  %v1816_v14 = vld [vmem:[#allocation3 + $0x1b8] sm:$0xf0] }
  0x4a   :  { %955 = vmatpush.bf16.msrb.mxu2 %v1991_v1  ;;  %v2388_v1 = vld [vmem:[#allocation3 + $0x1c4] sm:$0xf]  ;;  %v2386_v13 = vld [vmem:[#allocation3 + $0x1b4] sm:$0xf]  ;;  %v1616_v21 = vld [vmem:[#allocation3 + $0x28] sm:$0xf0] }
  0x4b   :  { %968 = vmatpush.bf16.msrb.mxu3 %v2055_v5  ;;  %v1763_v5 = vor.u32 %v2372_v63, %v1760_v0  ;;  %v1827_v9 = vor.u32 %v2388_v1, %v1824_v2  ;;  %v2352_v22 = vld [vmem:[#allocation3 + $0xa4] sm:$0xf]  ;;  %v1744_v28 = vld [vmem:[#allocation3 + $0x128] sm:$0xf0]  ;;  %v1619_v31 = vor.u32 %v2336_v20, %v1616_v21  ;;  %v2334_v35 = vld [vmem:[#allocation3 + $0x14] sm:$0xf] }
  0x4c   :  { %930 = vmatpush.bf16.msrb.mxu0 %v1855_v12  ;;  %v1752_v12 = vld [vmem:[#allocation3 + $0x138] sm:$0xf0]  ;;  %v2368_v25 = vld [vmem:[#allocation3 + $0x124] sm:$0xf]  ;;  %v2350_v37 = vld [vmem:[#allocation3 + $0x94] sm:$0xf] }
  0x4d   :  { %943 = vmatpush.bf16.msrb.mxu1 %v1919_v16  ;;  %v1691_v16 = vor.u32 %v2354_v8, %v1688_v10  ;;  %v1608_v36 = vld [vmem:[#allocation3 + $0x18] sm:$0xf0]  ;;  %v2332_v48 = vld [vmem:[#allocation3 + $0x4] sm:$0xf]  ;;  %v1664_v53 = vld [vmem:[#allocation3 + $0x88] sm:$0xf0] }
  0x4e   :  { %956 = vmatpush.bf16.msrb.mxu2 %v1983_v17  ;;  %v1755_v17 = vor.u32 %v2370_v11, %v1752_v12  ;;  %v1672_v41 = vld [vmem:[#allocation3 + $0x98] sm:$0xf0]  ;;  %v1611_v47 = vor.u32 %v2334_v35, %v1608_v36  ;;  %v2348_v52 = vld [vmem:[#allocation3 + $0x84] sm:$0xf]  ;;  %v1792_v58 = vld [vmem:[#allocation3 + $0x188] sm:$0xf0] }
  0x4f   :  { %969 = vmatpush.bf16.msrb.mxu3 %v2047_v23  ;;  %931 = vmatmul.bf16.vlgmr.msrb.gmra.mxu0 %v2657_v38  ;;  %v1819_v23 = vor.u32 %v2386_v13, %v1816_v14  ;;  %v1800_v46 = vld [vmem:[#allocation3 + $0x198] sm:$0xf0]  ;;  %v1675_v50 = vor.u32 %v2350_v37, %v1672_v41  ;;  %v2364_v54 = vld [vmem:[#allocation3 + $0x104] sm:$0xf]  ;;  %v2410_v59 = vld [vmem:[#allocation3 + $0x274] sm:$0xf]  ;;  %v1667_v2 = vor.u32 %v2348_v52, %v1664_v53 }
  0x50   :  { %975 = vmatpush.bf16.msra.mxu0 %v1659_v24  ;;  %944 = vmatmul.bf16.vlgmr.msrb.gmra.mxu1 %v2661_v43  ;;  %v1680_v24 = vld [vmem:[#allocation3 + $0xa8] sm:$0xf0]  ;;  %v1912_v60 = vld [vmem:[#allocation3 + $0x278] sm:$0xf0]  ;;  %v2442_v0 = vld [vmem:[#allocation3 + $0x374] sm:$0xf] }
  0x51   :  { %988 = vmatpush.bf16.msra.mxu1 %v1723_v29  ;;  %957 = vmatmul.bf16.vlgmr.msrb.gmra.mxu2 %v2655_v34  ;;  %v2384_v29 = vld [vmem:[#allocation3 + $0x1a4] sm:$0xf]  ;;  %v1683_v32 = vor.u32 %v2352_v22, %v1680_v24  ;;  %v1976_v63 = vld [vmem:[#allocation3 + $0x2f8] sm:$0xf0]  ;;  %v1915_v7 = vor.u32 %v2410_v59, %v1912_v60  ;;  %v1968_v13 = vld [vmem:[#allocation3 + $0x2e8] sm:$0xf0] }
  0x52   :  { %1001 = vmatpush.bf16.msra.mxu2 %v1787_v30  ;;  %970 = vmatmul.bf16.vlgmr.msrb.gmra.mxu3 %v2659_v39  ;;  %v1808_v30 = vld [vmem:[#allocation3 + $0x1a8] sm:$0xf0]  ;;  %v2040_v1 = vld [vmem:[#allocation3 + $0x378] sm:$0xf0]  ;;  %v2408_v8 = vld [vmem:[#allocation3 + $0x264] sm:$0xf] }
  0x53   :  { %1014 = vmatpush.bf16.msra.mxu3 %v1851_v33  ;;  %v1747_v33 = vor.u32 %v2368_v25, %v1744_v28  ;;  %v1811_v40 = vor.u32 %v2384_v29, %v1808_v30  ;;  %v2043_v11 = vor.u32 %v2442_v0, %v2040_v1  ;;  %v2424_v12 = vld [vmem:[#allocation3 + $0x2e4] sm:$0xf]  ;;  %v2096_v20 = vld [vmem:[#allocation3 + $0x3e8] sm:$0xf0]  ;;  %v2406_v24 = vld [vmem:[#allocation3 + $0x254] sm:$0xf] }
  0x54   :  { %976 = vmatpush.bf16.msra.mxu0 %v1651_v42  ;;  %v2366_v42 = vld [vmem:[#allocation3 + $0x114] sm:$0xf]  ;;  %v1971_v22 = vor.u32 %v2424_v12, %v1968_v13  ;;  %v1896_v25 = vld [vmem:[#allocation3 + $0x258] sm:$0xf0]  ;;  %v2404_v41 = vld [vmem:[#allocation3 + $0x244] sm:$0xf] }
  0x55   :  { %989 = vmatpush.bf16.msra.mxu1 %v1715_v44  ;;  %v1736_v44 = vld [vmem:[#allocation3 + $0x118] sm:$0xf0]  ;;  %v2422_v28 = vld [vmem:[#allocation3 + $0x2d4] sm:$0xf]  ;;  %v1899_v36 = vor.u32 %v2406_v24, %v1896_v25  ;;  %v2416_v0 = vld [vmem:[#allocation3 + $0x2a4] sm:$0xf] }
  0x56   :  { %1002 = vmatpush.bf16.msra.mxu2 %v1779_v45  ;;  %v2382_v45 = vld [vmem:[#allocation3 + $0x194] sm:$0xf]  ;;  %v1739_v51 = vor.u32 %v2366_v42, %v1736_v44  ;;  %v1960_v30 = vld [vmem:[#allocation3 + $0x2d8] sm:$0xf0]  ;;  %v1888_v42 = vld [vmem:[#allocation3 + $0x248] sm:$0xf0] }
  0x57   :  { %1015 = vmatpush.bf16.msra.mxu3 %v1843_v49  ;;  %v1600_v49 = vld [vmem:[#allocation3 + $0x8] sm:$0xf0]  ;;  %v2088_v35 = vld [vmem:[#allocation3 + $0x3d8] sm:$0xf0]  ;;  %v1963_v37 = vor.u32 %v2422_v28, %v1960_v30  ;;  %v2418_v52 = vld [vmem:[#allocation3 + $0x2b4] sm:$0xf] }
  0x58   :  { %977 = vmatpush.bf16.msra.mxu0 %v1643_v55  ;;  %v1803_v55 = vor.u32 %v2382_v45, %v1800_v46  ;;  %v1603_v62 = vor.u32 %v2332_v48, %v1600_v49  ;;  %v1952_v45 = vld [vmem:[#allocation3 + $0x2c8] sm:$0xf0]  ;;  %v2436_v46 = vld [vmem:[#allocation3 + $0x344] sm:$0xf]  ;;  %v2414_v12 = vld [vmem:[#allocation3 + $0x294] sm:$0xf] }
  0x59   :  { %990 = vmatpush.bf16.msra.mxu1 %v1707_v56  ;;  %v1728_v56 = vld [vmem:[#allocation3 + $0x108] sm:$0xf0]  ;;  %v2452_v48 = vld [vmem:[#allocation3 + $0x3c4] sm:$0xf] }
  0x5a   :  { %1003 = vmatpush.bf16.msra.mxu2 %v1771_v57  ;;  %v2380_v57 = vld [vmem:[#allocation3 + $0x184] sm:$0xf]  ;;  %v1856_v25 = vld [vmem:[#allocation3 + $0x208] sm:$0xf0] }
  0x5b   :  { %1016 = vmatpush.bf16.msra.mxu3 %v1835_v61  ;;  %v2426_v61 = vld [vmem:[#allocation3 + $0x2f4] sm:$0xf]  ;;  %v1795_v6 = vor.u32 %v2380_v57, %v1792_v58  ;;  %v2072_v58 = vld [vmem:[#allocation3 + $0x3b8] sm:$0xf0]  ;;  %v2412_v28 = vld [vmem:[#allocation3 + $0x284] sm:$0xf] }
  0x5c   :  { %978 = vmatpush.bf16.msra.mxu0 %v1635_v3  ;;  %v1731_v3 = vor.u32 %v2364_v54, %v1728_v56  ;;  %v1979_v10 = vor.u32 %v2426_v61, %v1976_v63  ;;  %v1944_v54 = vld [vmem:[#allocation3 + $0x2b8] sm:$0xf0]  ;;  %v2450_v57 = vld [vmem:[#allocation3 + $0x3b4] sm:$0xf]  ;;  %v1872_v63 = vld [vmem:[#allocation3 + $0x228] sm:$0xf0] }
  0x5d   :  { %991 = vmatpush.bf16.msra.mxu1 %v1699_v4  ;;  %v2458_v4 = vld [vmem:[#allocation3 + $0x3f4] sm:$0xf]  ;;  %v2008_v56 = vld [vmem:[#allocation3 + $0x338] sm:$0xf0]  ;;  %v1947_v60 = vor.u32 %v2418_v52, %v1944_v54  ;;  %v2075_v1 = vor.u32 %v2450_v57, %v2072_v58  ;;  %v2471_v52 = vld [vmem:[#allocation5 + $0x54] sm:$0xf0] }
  0x5e   :  { %1004 = vmatpush.bf16.msra.mxu2 %v1763_v5  ;;  %v2104_v5 = vld [vmem:[#allocation3 + $0x3f8] sm:$0xf0]  ;;  %v2468_v57 = vld [vmem:[#allocation5 + $0x44] sm:$0xf] }
  0x5f   :  { %1017 = vmatpush.bf16.msra.mxu3 %v1827_v9  ;;  %v1904_v9 = vld [vmem:[#allocation3 + $0x268] sm:$0xf0]  ;;  %v2107_v14 = vor.u32 %v2458_v4, %v2104_v5  ;;  %v2448_v5 = vld [vmem:[#allocation3 + $0x3a4] sm:$0xf] }
  0x60   :  { %979 = vmatpush.bf16.msra.mxu0 %v1627_v15  ;;  %v2440_v15 = vld [vmem:[#allocation3 + $0x364] sm:$0xf]  ;;  %v1907_v21 = vor.u32 %v2408_v8, %v1904_v9  ;;  %v2000_v4 = vld [vmem:[#allocation3 + $0x328] sm:$0xf0] }
  0x61   :  { %992 = vmatpush.bf16.msra.mxu1 %v1691_v16  ;;  %v2032_v16 = vld [vmem:[#allocation3 + $0x368] sm:$0xf0] }
  0x62   :  { %1005 = vmatpush.bf16.msra.mxu2 %v1755_v17  ;;  %v2456_v17 = vld [vmem:[#allocation3 + $0x3e4] sm:$0xf] }
  0x63   :  { %1018 = vmatpush.bf16.msra.mxu3 %v1819_v23  ;;  %v2035_v23 = vor.u32 %v2440_v15, %v2032_v16  ;;  %v2099_v29 = vor.u32 %v2456_v17, %v2096_v20  ;;  %v2430_v15 = vld [vmem:[#allocation3 + $0x314] sm:$0xf]  ;;  %v1992_v16 = vld [vmem:[#allocation3 + $0x318] sm:$0xf0] }
  0x64   :  { %980 = vmatpush.bf16.msra.mxu0 %v1619_v31  ;;  %v2438_v31 = vld [vmem:[#allocation3 + $0x354] sm:$0xf]  ;;  %v2056_v20 = vld [vmem:[#allocation3 + $0x398] sm:$0xf0]  ;;  %v1995_v24 = vor.u32 %v2430_v15, %v1992_v16  ;;  %v2110_v16 = vld [vmem:[#allocation5] sm:$0xf] }
  0x65   :  { %993 = vmatpush.bf16.msra.mxu1 %v1683_v32  ;;  %v2024_v32 = vld [vmem:[#allocation3 + $0x358] sm:$0xf0]  ;;  %v2446_v17 = vld [vmem:[#allocation3 + $0x394] sm:$0xf] }
  0x66   :  { %1006 = vmatpush.bf16.msra.mxu2 %v1747_v33  ;;  %v2454_v33 = vld [vmem:[#allocation3 + $0x3d4] sm:$0xf]  ;;  %v2059_v30 = vor.u32 %v2446_v17, %v2056_v20  ;;  %v2461_v17 = vld [vmem:[#allocation5 + $0x4] sm:$0xf0]  ;;  %v2460_v20 = vld [vmem:[#allocation5 + $0x4] sm:$0xf] }
  0x67   :  { %1019 = vmatpush.bf16.msra.mxu3 %v1811_v40  ;;  %v2027_v40 = vor.u32 %v2438_v31, %v2024_v32  ;;  %v2091_v44 = vor.u32 %v2454_v33, %v2088_v35  ;;  %v2428_v31 = vld [vmem:[#allocation3 + $0x304] sm:$0xf]  ;;  %v1984_v32 = vld [vmem:[#allocation3 + $0x308] sm:$0xf0] }
  0x68   :  { %981 = vmatpush.bf16.msra.mxu0 %v1611_v47  ;;  %v2016_v47 = vld [vmem:[#allocation3 + $0x348] sm:$0xf0]  ;;  %v2444_v33 = vld [vmem:[#allocation3 + $0x384] sm:$0xf] }
  0x69   :  { %994 = vmatpush.bf16.msra.mxu1 %v1675_v50  ;;  %v2402_v50 = vld [vmem:[#allocation3 + $0x234] sm:$0xf]  ;;  %v2048_v35 = vld [vmem:[#allocation3 + $0x388] sm:$0xf0] }
  0x6a   :  { %1007 = vmatpush.bf16.msra.mxu2 %v1739_v51  ;;  %v1880_v51 = vld [vmem:[#allocation3 + $0x238] sm:$0xf0] }
  0x6b   :  { %1020 = vmatpush.bf16.msra.mxu3 %v1803_v55  ;;  %v2434_v55 = vld [vmem:[#allocation3 + $0x334] sm:$0xf]  ;;  %v1883_v59 = vor.u32 %v2402_v50, %v1880_v51  ;;  %v2150_v51 = vld [vmem:[#allocation5 + $0x50] sm:$0xf] }
  0x6c   :  { %982 = vmatpush.bf16.msra.mxu0 %v1603_v62  ;;  %v2011_v61 = vor.u32 %v2434_v55, %v2008_v56  ;;  %v2400_v62 = vld [vmem:[#allocation3 + $0x224] sm:$0xf]  ;;  %v2151_v54 = vor.u32 %v2471_v52, %v2150_v51  ;;  %v2142_v55 = vld [vmem:[#allocation5 + $0x40] sm:$0xf]  ;;  %v2469_v56 = vld [vmem:[#allocation5 + $0x44] sm:$0xf0] }
  0x6d   :  { %995 = vmatpush.bf16.msra.mxu1 %v1667_v2  ;;  %v1936_v2 = vld [vmem:[#allocation3 + $0x2a8] sm:$0xf0] }
  0x6e   :  { %1008 = vmatpush.bf16.msra.mxu2 %v1731_v3  ;;  %v2432_v3 = vld [vmem:[#allocation3 + $0x324] sm:$0xf]  ;;  %v1939_v8 = vor.u32 %v2416_v0, %v1936_v2  ;;  %v2465_v2 = vld [vmem:[#allocation5 + $0x24] sm:$0xf0] }
  0x6f   :  { %1021 = vmatpush.bf16.msra.mxu3 %v1795_v6  ;;  %983 = vmatmul.bf16.vlgmr.msra.gmra.mxu0 %v2642_v19  ;;  %v2080_v19 = vld [vmem:[#allocation3 + $0x3c8] sm:$0xf0]  ;;  %v2003_v9 = vor.u32 %v2432_v3, %v2000_v4  ;;  %v2464_v3 = vld [vmem:[#allocation5 + $0x24] sm:$0xf] }
  0x70   :  { %1027 = vmatpush.bf16.msrb.mxu0 %v1915_v7  ;;  %996 = vmatmul.bf16.vlgmr.msra.gmra.mxu1 %v2646_v27  ;;  %v2019_v27 = vor.u32 %v2436_v46, %v2016_v47  ;;  %v2083_v53 = vor.u32 %v2452_v48, %v2080_v19  ;;  %v2064_v6 = vld [vmem:[#allocation3 + $0x3a8] sm:$0xf0]  ;;  %v1875_v7 = vor.u32 %v2400_v62, %v1872_v63  ;;  %v2158_v48 = vld [vmem:[#allocation5 + $0x60] sm:$0xf]  ;;  %v2473_v19 = vld [vmem:[#allocation5 + $0x64] sm:$0xf0] }
  0x71   :  { %1040 = vmatpush.bf16.msrb.mxu1 %v1979_v10  ;;  %1009 = vmatmul.bf16.vlgmr.msra.gmra.mxu2 %v2640_v18  ;;  %v2420_v18 = vld [vmem:[#allocation3 + $0x2c4] sm:$0xf]  ;;  %v2398_v10 = vld [vmem:[#allocation3 + $0x214] sm:$0xf]  ;;  %v2067_v13 = vor.u32 %v2448_v5, %v2064_v6  ;;  %v2136_v63 = vld [vmem:[#allocation5 + $0x38] sm:$0xf0] }
  0x72   :  { %1053 = vmatpush.bf16.msrb.mxu2 %v2043_v11  ;;  %1022 = vmatmul.bf16.vlgmr.msra.gmra.mxu3 %v2644_v26  ;;  %v1891_v26 = vor.u32 %v2404_v41, %v1888_v42  ;;  %v1955_v49 = vor.u32 %v2420_v18, %v1952_v45  ;;  %v1864_v11 = vld [vmem:[#allocation3 + $0x218] sm:$0xf0]  ;;  %v2474_v41 = vld [vmem:[#allocation5 + $0x74] sm:$0xf]  ;;  %v2051_v45 = vor.u32 %v2444_v33, %v2048_v35  ;;  %v2128_v5 = vld [vmem:[#allocation5 + $0x28] sm:$0xf0] }
  0x73   :  { %1066 = vmatpush.bf16.msrb.mxu3 %v2107_v14  ;;  %v1928_v14 = vld [vmem:[#allocation3 + $0x298] sm:$0xf0]  ;;  %v2131_v6 = vor.u32 %v2464_v3, %v2128_v5  ;;  %v2485_v3 = vld [vmem:[#allocation5 + $0xc4] sm:$0xf0]  ;;  %v2208_v5 = vld [vmem:[#allocation5 + $0xc8] sm:$0xf0] }
  0x74   :  { %1028 = vmatpush.bf16.msrb.mxu0 %v1907_v21  ;;  %v1867_v21 = vor.u32 %v2398_v10, %v1864_v11  ;;  %v2168_v42 = vld [vmem:[#allocation5 + $0x78] sm:$0xf0] }
  0x75   :  { %1041 = vmatpush.bf16.msrb.mxu1 %v1971_v22  ;;  %v2396_v22 = vld [vmem:[#allocation3 + $0x204] sm:$0xf]  ;;  %v2171_v47 = vor.u32 %v2474_v41, %v2168_v42  ;;  %v2120_v11 = vld [vmem:[#allocation5 + $0x18] sm:$0xf0] }
  0x76   :  { %1054 = vmatpush.bf16.msrb.mxu2 %v2035_v23  ;;  %v1931_v23 = vor.u32 %v2414_v12, %v1928_v14  ;;  %v2678_v12 = vld [vmem:[%s2765_s2] sm:$0x3] }
  0x77   :  { %1067 = vmatpush.bf16.msrb.mxu3 %v2099_v29  ;;  %v1920_v29 = vld [vmem:[#allocation3 + $0x288] sm:$0xf0] }
  0x78   :  { %1029 = vmatpush.bf16.msrb.mxu0 %v1899_v36  ;;  %v2166_v36 = vld [vmem:[#allocation5 + $0x70] sm:$0xf]  ;;  %v1923_v18 = vor.u32 %v2412_v28, %v1920_v29 }
  0x79   :  { %1042 = vmatpush.bf16.msrb.mxu1 %v1963_v37  ;;  %v2475_v37 = vld [vmem:[#allocation5 + $0x74] sm:$0xf0] }
  0x7a   :  { %1055 = vmatpush.bf16.msrb.mxu2 %v2027_v40  ;;  %v1859_v40 = vor.u32 %v2396_v22, %v1856_v25  ;;  %v2167_v46 = vor.u32 %v2475_v37, %v2166_v36  ;;  %v2111_v22 = vor.u32 %v2461_v17, %v2110_v16  ;;  %v2481_v16 = vld [vmem:[#allocation5 + $0xa4] sm:$0xf0]  ;;  %v2480_v17 = vld [vmem:[#allocation5 + $0xa4] sm:$0xf] }
  0x7b   :  { %1068 = vmatpush.bf16.msrb.mxu3 %v2091_v44  ;;  %v1987_v44 = vor.u32 %v2428_v31, %v1984_v32 }
  0x7c   :  { %1030 = vmatpush.bf16.msrb.mxu0 %v1891_v26  ;;  %v2472_v26 = vld [vmem:[#allocation5 + $0x64] sm:$0xf] }
  0x7d   :  { %1043 = vmatpush.bf16.msrb.mxu1 %v1955_v49  ;;  %v2159_v49 = vor.u32 %v2473_v19, %v2158_v48  ;;  %v2491_v48 = vld [vmem:[#allocation5 + $0xf4] sm:$0xf0]  ;;  %v2490_v19 = vld [vmem:[#allocation5 + $0xf4] sm:$0xf] }
  0x7e   :  { %1056 = vmatpush.bf16.msrb.mxu2 %v2019_v27  ;;  %v2160_v27 = vld [vmem:[#allocation5 + $0x68] sm:$0xf0] }
  0x7f   :  { %1069 = vmatpush.bf16.msrb.mxu3 %v2083_v53  ;;  %v2163_v50 = vor.u32 %v2472_v26, %v2160_v27  ;;  %v2470_v53 = vld [vmem:[#allocation5 + $0x54] sm:$0xf]  ;;  %v2222_v27 = vld [vmem:[#allocation5 + $0xe0] sm:$0xf] }
  0x80   :  { %1031 = vmatpush.bf16.msrb.mxu0 %v1883_v59  ;;  %v2134_v59 = vld [vmem:[#allocation5 + $0x30] sm:$0xf] }
  0x81   :  { %1044 = vmatpush.bf16.msrb.mxu1 %v1947_v60  ;;  %v2467_v60 = vld [vmem:[#allocation5 + $0x34] sm:$0xf0] }
  0x82   :  { %1057 = vmatpush.bf16.msrb.mxu2 %v2011_v61  ;;  %v2466_v61 = vld [vmem:[#allocation5 + $0x34] sm:$0xf]  ;;  %v2135_v62 = vor.u32 %v2467_v60, %v2134_v59 }
  0x83   :  { %1070 = vmatpush.bf16.msrb.mxu3 %v2075_v1  ;;  %v2139_v0 = vor.u32 %v2466_v61, %v2136_v63  ;;  %v2126_v1 = vld [vmem:[#allocation5 + $0x20] sm:$0xf]  ;;  %v2486_v59 = vld [vmem:[#allocation5 + $0xd4] sm:$0xf]  ;;  %v2216_v63 = vld [vmem:[#allocation5 + $0xd8] sm:$0xf0] }
  0x84   :  { %1032 = vmatpush.bf16.msrb.mxu0 %v1875_v7  ;;  %v2127_v4 = vor.u32 %v2465_v2, %v2126_v1  ;;  %v2118_v7 = vld [vmem:[#allocation5 + $0x10] sm:$0xf]  ;;  %v2219_v1 = vor.u32 %v2486_v59, %v2216_v63  ;;  %v2206_v2 = vld [vmem:[#allocation5 + $0xc0] sm:$0xf]  ;;  %v2506_v63 = vld [vmem:[%s2768_s5 + $0x70] sm:$0xff] }
  0x85   :  { %1045 = vmatpush.bf16.msrb.mxu1 %v1939_v8  ;;  %v2463_v8 = vld [vmem:[#allocation5 + $0x14] sm:$0xf0] }
  0x86   :  { %1058 = vmatpush.bf16.msrb.mxu2 %v2003_v9  ;;  %v2462_v9 = vld [vmem:[#allocation5 + $0x14] sm:$0xf]  ;;  %v2119_v10 = vor.u32 %v2463_v8, %v2118_v7  ;;  %v2198_v8 = vld [vmem:[#allocation5 + $0xb0] sm:$0xf] }
  0x87   :  { %1071 = vmatpush.bf16.msrb.mxu3 %v2067_v13  ;;  %v2123_v14 = vor.u32 %v2462_v9, %v2120_v11  ;;  %v2483_v9 = vld [vmem:[#allocation5 + $0xb4] sm:$0xf0] }
  0x88   :  { %1033 = vmatpush.bf16.msrb.mxu0 %v1867_v21  ;;  %v227_v21 = vperm.slane %v2678_v12, 0  ;;  %v2199_v11 = vor.u32 %v2483_v9, %v2198_v8 }
  0x89   :  { %1046 = vmatpush.bf16.msrb.mxu1 %v1931_v23  ;;  %v2112_v23 = vld [vmem:[#allocation5 + $0x8] sm:$0xf0] }
  0x8a   :  { %1059 = vmatpush.bf16.msrb.mxu2 %v1995_v24  ;;  %v2115_v24 = vor.u32 %v2460_v20, %v2112_v23 }
  0x8b   :  { %1072 = vmatpush.bf16.msrb.mxu3 %v2059_v30 }
  0x8c   :  { %1034 = vmatpush.bf16.msrb.mxu0 %v1859_v40 }
  0x8d   :  { %1047 = vmatpush.bf16.msrb.mxu1 %v1923_v18 }
  0x8e   :  { %1060 = vmatpush.bf16.msrb.mxu2 %v1987_v44 }
  0x8f   :  { %1073 = vmatpush.bf16.msrb.mxu3 %v2051_v45  ;;  %1035 = vmatmul.bf16.vlgmr.msrb.gmra.mxu0 %v2657_v38  ;;  %v2152_v38 = vld [vmem:[#allocation5 + $0x58] sm:$0xf0] }
  0x90   :  { %1285 = vmatpush.bf16.msra.mxu0 %v2167_v46  ;;  %1048 = vmatmul.bf16.vlgmr.msrb.gmra.mxu1 %v2661_v43  ;;  %v2155_v43 = vor.u32 %v2470_v53, %v2152_v38  ;;  %v2224_v38 = vld [vmem:[#allocation5 + $0xe8] sm:$0xf0] }
  0x91   :  { %1061 = vmatmul.bf16.vlgmr.msrb.gmra.mxu2 %v2655_v34  ;;  %v2144_v34 = vld [vmem:[#allocation5 + $0x48] sm:$0xf0] }
  0x92   :  { %1311 = vmatpush.bf16.msra.mxu2 %v2171_v47  ;;  %1074 = vmatmul.bf16.vlgmr.msrb.gmra.mxu3 %v2659_v39  ;;  %v2143_v39 = vor.u32 %v2469_v56, %v2142_v55  ;;  %v2147_v58 = vor.u32 %v2468_v57, %v2144_v34  ;;  %v2230_v47 = vld [vmem:[#allocation5 + $0xf0] sm:$0xf] }
  0x93   :  { %v2231_v26 = vor.u32 %v2491_v48, %v2230_v47 }
  0x94   :  { %1286 = vmatpush.bf16.msra.mxu0 %v2159_v49  ;;  %v2232_v49 = vld [vmem:[#allocation5 + $0xf8] sm:$0xf0] }
  0x95   :  { %v2235_v53 = vor.u32 %v2490_v19, %v2232_v49  ;;  %1298 = vmatpush.bf16.msra.mxu1 %v2231_v26 }
  0x96   :  { %1312 = vmatpush.bf16.msra.mxu2 %v2163_v50  ;;  %v2489_v50 = vld [vmem:[#allocation5 + $0xe4] sm:$0xf0] }
  0x97   :  { %v2223_v56 = vor.u32 %v2489_v50, %v2222_v27  ;;  %1324 = vmatpush.bf16.msra.mxu3 %v2235_v53 }
  0x98   :  { %1287 = vmatpush.bf16.msra.mxu0 %v2151_v54  ;;  %v2488_v54 = vld [vmem:[#allocation5 + $0xe4] sm:$0xf] }
  0x99   :  { %v2227_v57 = vor.u32 %v2488_v54, %v2224_v38  ;;  %1299 = vmatpush.bf16.msra.mxu1 %v2223_v56 }
  0x9a   :  { %1313 = vmatpush.bf16.msra.mxu2 %v2155_v43 }
  0x9b   :  { %1325 = vmatpush.bf16.msra.mxu3 %v2227_v57 }
  0x9c   :  { %1288 = vmatpush.bf16.msra.mxu0 %v2143_v39  ;;  %v2214_v39 = vld [vmem:[#allocation5 + $0xd0] sm:$0xf] }
  0x9e   :  { %1314 = vmatpush.bf16.msra.mxu2 %v2147_v58  ;;  %v2487_v58 = vld [vmem:[#allocation5 + $0xd4] sm:$0xf0] }
  0x9f   :  { %1326 = vmatpush.bf16.msra.mxu3 %v2219_v1  ;;  %v2505_v1 = vld [vmem:[%s2768_s5 + $0x68] sm:$0xff] }
  0xa0   :  { %1289 = vmatpush.bf16.msra.mxu0 %v2135_v62  ;;  %v2215_v62 = vor.u32 %v2487_v58, %v2214_v39 }
  0xa2   :  { %1315 = vmatpush.bf16.msra.mxu2 %v2139_v0  ;;  %1300 = vmatpush.bf16.msra.mxu1 %v2215_v62  ;;  %v2498_v62 = vld [vmem:[%s2768_s5 + $0x30] sm:$0xff] }
  0xa4   :  { %1290 = vmatpush.bf16.msra.mxu0 %v2127_v4  ;;  %v2484_v4 = vld [vmem:[#allocation5 + $0xc4] sm:$0xf] }
  0xa5   :  { %v2211_v7 = vor.u32 %v2484_v4, %v2208_v5  ;;  %v2495_v4 = vld [vmem:[%s2768_s5 + $0x18] sm:$0xff] }
  0xa6   :  { %1316 = vmatpush.bf16.msra.mxu2 %v2131_v6  ;;  %v2207_v6 = vor.u32 %v2485_v3, %v2206_v2  ;;  %v2496_v2 = vld [vmem:[%s2768_s5 + $0x20] sm:$0xff]  ;;  %v2503_v5 = vld [vmem:[%s2768_s5 + $0x58] sm:$0xff] }
  0xa7   :  { %1327 = vmatpush.bf16.msra.mxu3 %v2211_v7  ;;  %v2504_v3 = vld [vmem:[%s2768_s5 + $0x60] sm:$0xff]  ;;  %v2494_v7 = vld [vmem:[%s2768_s5 + $0x10] sm:$0xff] }
  0xa8   :  { %1291 = vmatpush.bf16.msra.mxu0 %v2119_v10  ;;  %1301 = vmatpush.bf16.msra.mxu1 %v2207_v6  ;;  %v2482_v10 = vld [vmem:[#allocation5 + $0xb4] sm:$0xf] }
  0xaa   :  { %1317 = vmatpush.bf16.msra.mxu2 %v2123_v14 }
  0xac   :  { %1292 = vmatpush.bf16.msra.mxu0 %v2111_v22  ;;  %1302 = vmatpush.bf16.msra.mxu1 %v2199_v11  ;;  %v2192_v22 = vld [vmem:[#allocation5 + $0xa8] sm:$0xf0]  ;;  %v2493_v11 = vld [vmem:[%s2768_s5 + $0x8] sm:$0xff] }
  0xae   :  { %v880_v13 = vpop.f32.mrf.mxu0  ;;  %1318 = vmatpush.bf16.msra.mxu2 %v2115_v24  ;;  %v2195_v24 = vor.u32 %v2480_v17, %v2192_v22  ;;  %v2515_v17 = vld [vmem:[%s2770_s7 + $0x38] sm:$0xff]  ;;  %v1119_v22 = vld [vmem:[%s2767_s4] sm:$0x3] }
  0xaf   :  { %v881_v29 = vadd.f32 %v880_v13, %v227_v21  ;;  %v2200_v13 = vld [vmem:[#allocation5 + $0xb8] sm:$0xf0] }
  0xb0   :  { %v2203_v14 = vor.u32 %v2482_v10, %v2200_v13  ;;  %v2502_v13 = vld [vmem:[%s2768_s5 + $0x50] sm:$0xff] }
  0xb1   :  { %v893_v15 = vpop.f32.mrf.mxu1 }
  0xb2   :  { %v894_v32 = vadd.f32 %v893_v15, %v881_v29  ;;  %v2190_v15 = vld [vmem:[#allocation5 + $0xa0] sm:$0xf]  ;;  %1328 = vmatpush.bf16.msra.mxu3 %v2203_v14  ;;  %v2478_v29 = vld [vmem:[#allocation5 + $0x94] sm:$0xf]  ;;  %1575 = vmatpush.bf16.msrb.mxu2 %v2515_v17 }
  0xb3   :  { %v2191_v21 = vor.u32 %v2481_v16, %v2190_v15  ;;  %v2492_v14 = vld [vmem:[%s2768_s5] sm:$0xff]  ;;  %v2501_v15 = vld [vmem:[%s2768_s5 + $0x48] sm:$0xff] }
  0xb4   :  { %v2500_v16 = vld [vmem:[%s2768_s5 + $0x40] sm:$0xff] }
  0xb5   :  { %v919_v28 = vpop.f32.mrf.mxu3  ;;  %1303 = vmatpush.bf16.msra.mxu1 %v2191_v21  ;;  %v2513_v21 = vld [vmem:[%s2770_s7 + $0x28] sm:$0xff] }
  0xb6   :  { %v906_v25 = vpop.f32.mrf.mxu2  ;;  %v882_v30 = vpop.f32.mrf.mxu0  ;;  %1329 = vmatpush.bf16.msra.mxu3 %v2195_v24  ;;  %v1121_v24 = vperm.slane %v1119_v22, 0 }
  0xb7   :  { %v907_v36 = vadd.f32 %v906_v25, %v894_v32  ;;  %v2182_v25 = vld [vmem:[#allocation5 + $0x90] sm:$0xf]  ;;  %v2184_v32 = vld [vmem:[#allocation5 + $0x98] sm:$0xf0] }
  0xb9   :  { %v895_v31 = vpop.f32.mrf.mxu1  ;;  %v920_v37 = vadd.f32 %v919_v28, %v907_v36  ;;  %v2479_v28 = vld [vmem:[#allocation5 + $0x94] sm:$0xf0] }
  0xba   :  { %v2183_v31 = vor.u32 %v2479_v28, %v2182_v25  ;;  %v2511_v25 = vld [vmem:[%s2770_s7 + $0x18] sm:$0xff] }
  0xbc   :  { %1304 = vmatpush.bf16.msra.mxu1 %v2183_v31 }
  0xbd   :  { %v921_v35 = vpop.f32.mrf.mxu3 }
  0xbe   :  { %v908_v33 = vpop.f32.mrf.mxu2  ;;  %v2187_v35 = vor.u32 %v2478_v29, %v2184_v32 }
  0xc0   :  { %1330 = vmatpush.bf16.msra.mxu3 %v2187_v35 }
  0xcc   :  { %v932_v40 = vpop.f32.mrf.mxu0 }
  0xcd   :  { %v933_v41 = vadd.f32 %v932_v40, %v920_v37  ;;  %v945_v42 = vpop.f32.mrf.mxu1  ;;  %v2174_v37 = vld [vmem:[#allocation5 + $0x80] sm:$0xf]  ;;  %v2477_v40 = vld [vmem:[#allocation5 + $0x84] sm:$0xf0] }
  0xcf   :  { %v946_v18 = vadd.f32 %v945_v42, %v933_v41  ;;  %v2476_v41 = vld [vmem:[#allocation5 + $0x84] sm:$0xf] }
  0xd4   :  { %v958_v44 = vpop.f32.mrf.mxu2  ;;  %v934_v52 = vpop.f32.mrf.mxu0 }
  0xd5   :  { %v959_v45 = vadd.f32 %v958_v44, %v946_v18  ;;  %v971_v46 = vpop.f32.mrf.mxu3  ;;  %v947_v55 = vpop.f32.mrf.mxu1  ;;  %v2175_v18 = vor.u32 %v2477_v40, %v2174_v37  ;;  %v2176_v44 = vld [vmem:[#allocation5 + $0x88] sm:$0xf0] }
  0xd7   :  { %v972_v51 = vadd.f32 %v971_v46, %v959_v45  ;;  %v2179_v45 = vor.u32 %v2476_v41, %v2176_v44  ;;  %1305 = vmatpush.bf16.msra.mxu1 %v2175_v18  ;;  %v228_v46 = vperm.slane %v2678_v12, 1 }
  0xd9   :  { %vm1079_vm0 = vcmp.gt.f32.partialorder %v972_v51, 0.0  ;;  %v1081_v43 = vmul.f32 0.2, %v972_v51  ;;  %1331 = vmatpush.bf16.msra.mxu3 %v2179_v45 }
  0xdb   :  { %v1083_v34 = vsel %vm1079_vm0, %v972_v51, %v1081_v43 }
  0xdc   :  { %v1085_v60 = vpack.c.bf16 %v1083_v34, %v1083_v34  ;;  %v960_v61 = vpop.f32.mrf.mxu2 }
  0xdd   :  { %v973_v0 = vpop.f32.mrf.mxu3  ;;  %v2507_v61 = vld [vmem:[%s2768_s5 + $0x78] sm:$0xff] }
  0xde   :  { %1293 = vmatmul.bf16.vlgmr.msra.gmra.mxu0 %v1085_v60  ;;  %1319 = vmatmul.bf16.vlgmr.msra.gmra.mxu2 %v1085_v60  ;;  %v2499_v60 = vld [vmem:[%s2768_s5 + $0x38] sm:$0xff]  ;;  %v2497_v0 = vld [vmem:[%s2768_s5 + $0x28] sm:$0xff] }
  0xdf   :  { %1477 = vmatpush.bf16.msrb.mxu0 %v2499_v60  ;;  %1490 = vmatpush.bf16.msrb.mxu1 %v2507_v61 }
  0xe3   :  { %1478 = vmatpush.bf16.msrb.mxu0 %v2498_v62  ;;  %1491 = vmatpush.bf16.msrb.mxu1 %v2506_v63 }
  0xe7   :  { %1479 = vmatpush.bf16.msrb.mxu0 %v2497_v0  ;;  %1492 = vmatpush.bf16.msrb.mxu1 %v2505_v1 }
  0xeb   :  { %1480 = vmatpush.bf16.msrb.mxu0 %v2496_v2  ;;  %1493 = vmatpush.bf16.msrb.mxu1 %v2504_v3 }
  0xec   :  { %v984_v20 = vpop.f32.mrf.mxu0 }
  0xed   :  { %v997_v23 = vpop.f32.mrf.mxu1  ;;  %v985_v19 = vadd.f32 %v984_v20, %v228_v46  ;;  %v2514_v20 = vld [vmem:[%s2770_s7 + $0x30] sm:$0xff] }
  0xee   :  { %1576 = vmatpush.bf16.msrb.mxu2 %v2514_v20  ;;  %v2510_v46 = vld [vmem:[%s2770_s7 + $0x10] sm:$0xff] }
  0xef   :  { %v998_v26 = vadd.f32 %v997_v23, %v985_v19  ;;  %1481 = vmatpush.bf16.msrb.mxu0 %v2495_v4  ;;  %1494 = vmatpush.bf16.msrb.mxu1 %v2503_v5  ;;  %v2512_v23 = vld [vmem:[%s2770_s7 + $0x20] sm:$0xff] }
  0xf2   :  { %1577 = vmatpush.bf16.msrb.mxu2 %v2513_v21 }
  0xf3   :  { %1482 = vmatpush.bf16.msrb.mxu0 %v2494_v7  ;;  %1495 = vmatpush.bf16.msrb.mxu1 %v2502_v13 }
  0xf4   :  { %v1010_v30 = vpop.f32.mrf.mxu2  ;;  %v986_v36 = vpop.f32.mrf.mxu0 }
  0xf5   :  { %v1023_v33 = vpop.f32.mrf.mxu3  ;;  %v999_v42 = vpop.f32.mrf.mxu1  ;;  %v1011_v49 = vadd.f32 %v1010_v30, %v998_v26  ;;  %v1122_v30 = vperm.slane %v1119_v22, 1  ;;  %v2520_v26 = vld [vmem:[%s2769_s6] ss:$0 sm:$0xff] }
  0xf6   :  { %1578 = vmatpush.bf16.msrb.mxu2 %v2512_v23 }
  0xf7   :  { %v1024_v27 = vadd.f32 %v1023_v33, %v1011_v49  ;;  %1483 = vmatpush.bf16.msrb.mxu0 %v2493_v11  ;;  %1496 = vmatpush.bf16.msrb.mxu1 %v2501_v15 }
  0xfa   :  { %1579 = vmatpush.bf16.msrb.mxu2 %v2511_v25 }
  0xfb   :  { %1484 = vmatpush.bf16.msrb.mxu0 %v2492_v14  ;;  %1497 = vmatpush.bf16.msrb.mxu1 %v2500_v16 }
  0xfc   :  { %v1012_v47 = vpop.f32.mrf.mxu2 }
  0xfd   :  { %v1025_v48 = vpop.f32.mrf.mxu3  ;;  %v2509_v47 = vld [vmem:[%s2770_s7 + $0x8] sm:$0xff] }
  0xfe   :  { %1580 = vmatpush.bf16.msrb.mxu2 %v2510_v46  ;;  %v2508_v48 = vld [vmem:[%s2770_s7] sm:$0xff] }
 0x102   :  { %1581 = vmatpush.bf16.msrb.mxu2 %v2509_v47 }
 0x106   :  { %1582 = vmatpush.bf16.msrb.mxu2 %v2508_v48 }
 0x10c   :  { %v1036_v50 = vpop.f32.mrf.mxu0 }
 0x10d   :  { %v1049_v51 = vpop.f32.mrf.mxu1  ;;  %v1037_v52 = vadd.f32 %v1036_v50, %v1024_v27 }
 0x10f   :  { %v1050_v53 = vadd.f32 %v1049_v51, %v1037_v52 }
 0x114   :  { %v1062_v54 = vpop.f32.mrf.mxu2  ;;  %v1038_v56 = vpop.f32.mrf.mxu0 }
 0x115   :  { %v1063_v38 = vadd.f32 %v1062_v54, %v1050_v53  ;;  %v1075_v55 = vpop.f32.mrf.mxu3  ;;  %v1051_v43 = vpop.f32.mrf.mxu1 }
 0x117   :  { %v1076_v57 = vadd.f32 %v1075_v55, %v1063_v38  ;;  %v2521_v55 = vld [vmem:[#allocation2] ss:$0 sm:$0xff] }
 0x119   :  { %vm1080_vm1 = vcmp.gt.f32.partialorder %v1076_v57, 0.0  ;;  %v1082_v34 = vmul.f32 0.2, %v1076_v57 }
 0x11b   :  { %v1084_v12 = vsel %vm1080_vm1, %v1076_v57, %v1082_v34 }
 0x11c   :  { %v1086_v39 = vpack.c.bf16 %v1084_v12, %v1084_v12  ;;  %v1064_v58 = vpop.f32.mrf.mxu2 }
 0x11d   :  { %v1077_v59 = vpop.f32.mrf.mxu3 }
 0x11e   :  { %1306 = vmatmul.bf16.vlgmr.msra.gmra.mxu1 %v1086_v39  ;;  %1332 = vmatmul.bf16.vlgmr.msra.gmra.mxu3 %v1086_v39 }
 0x15b   :  { %v1294_v6 = vpop.f32.mrf.mxu0 }
 0x15c   :  { %v1295_v28 = vadd.f32 %v1294_v6, %v1121_v24 }
 0x161   :  { %v1320_v8 = vpop.f32.mrf.mxu2 }
 0x162   :  { %v1321_v33 = vadd.f32 %v1320_v8, %v1122_v30 }
 0x163   :  { %v1296_v9 = vpop.f32.mrf.mxu0 }
 0x169   :  { %v1322_v10 = vpop.f32.mrf.mxu2 }
 0x19b   :  { %v1307_v29 = vpop.f32.mrf.mxu1 }
 0x19c   :  { %v1308_v31 = vadd.f32 %v1307_v29, %v1295_v28 }
 0x19e   :  { %vm1337_vm2 = vcmp.gt.f32.partialorder %v1308_v31, 0.0  ;;  %v1339_v32 = vmul.f32 0.2, %v1308_v31 }
 0x1a0   :  { %v1341_v35 = vsel %vm1337_vm2, %v1308_v31, %v1339_v32 }
 0x1a1   :  { %v1343_v36 = vpack.c.bf16 %v1341_v35, %v1341_v35  ;;  %v1333_v37 = vpop.f32.mrf.mxu3 }
 0x1a2   :  { %v1334_v40 = vadd.f32 %v1333_v37, %v1321_v33 }
 0x1a3   :  { %v1309_v41 = vpop.f32.mrf.mxu1  ;;  %1485 = vmatmul.bf16.vlgmr.msrb.gmra.mxu0 %v1343_v36 }
 0x1a4   :  { %vm1338_vm3 = vcmp.gt.f32.partialorder %v1334_v40, 0.0  ;;  %v1340_v42 = vmul.f32 0.2, %v1334_v40 }
 0x1a6   :  { %v1342_v18 = vsel %vm1338_vm3, %v1334_v40, %v1340_v42 }
 0x1a7   :  { %v1344_v44 = vpack.c.bf16 %v1342_v18, %v1342_v18 }
 0x1a9   :  { %v1335_v45 = vpop.f32.mrf.mxu3  ;;  %1498 = vmatmul.bf16.vlgmr.msrb.gmra.mxu1 %v1344_v44 }
 0x220   :  { %v1486_v19 = vpop.f32.mrf.mxu0 }
 0x221   :  { %v1487_v49 = vadd.f32 %v2520_v26, %v1486_v19 }
 0x226   :  { %v1499_v27 = vpop.f32.mrf.mxu1 }
 0x227   :  { %v1500_v50 = vadd.f32 %v1499_v27, %v1487_v49 }
 0x228   :  { %v1488_v51 = vpop.f32.mrf.mxu0 }
 0x229   :  { %vm1503_vm4 = vcmp.gt.f32.partialorder %v1500_v50, 0.0  ;;  %v1504_v52 = vmul.f32 0.2, %v1500_v50 }
 0x22b   :  { %v1505_v53 = vsel %vm1503_vm4, %v1500_v50, %v1504_v52 }
 0x22c   :  { %v1506_v54 = vpack.c.bf16 %v1505_v53, %v1505_v53 }
 0x22e   :  { %v1501_v38 = vpop.f32.mrf.mxu1  ;;  %1583 = vmatmul.bf16.vlgmr.msrb.gmra.mxu2 %v1506_v54 }
 0x2b1   :  { %v1584_v56 = vpop.f32.mrf.mxu2 }
 0x2b2   :  { %v1585_v43 = vadd.f32 %v2521_v55, %v1584_v56 }
 0x2b4   :  { %1589 = vst.msk [vmem:[%s2772_s9] sm:$0x3] %vm1588_vm5, %v1585_v43 }
 0x2b9   :  { %v1586_v57 = vpop.f32.mrf.mxu2 }
 0x2ba   :  { %1594 = vsyncpa [#allocation4], 1 }
 0x2bb   :  { %1595 = vsyncpa [#allocation6], 1 }

</bundles_post_ra>
